<compile_context>
chip_gen: v5e
topology: v5e:2x2
jax: 0.10.0
libtpu: 0.0.40
codegen_flags: <defaults>
</compile_context>

<pallas_src>
import math

import jax
import jax.numpy as jnp
from jax.experimental import pallas as pl
from jax.experimental.pallas import tpu as pltpu


def _round_up(n, m):
    return ((n + m - 1) // m) * m


def _default_num_tiles():
    # 2 TensorCores per chip on v7x; 1 on v5e/v6e.  grid=(2,) + "parallel"
    # shards the batch tiles across both TCs; grid=(1,) is best on single-TC.
    try:
        kind = jax.devices()[0].device_kind.lower()
    except Exception:
        return 1
    return 2 if ("v7" in kind or "tpu7" in kind) else 1


def _pack_factor(B, F, O, H, max_weight_bytes=8 << 20, itemsize=4):
    """Smallest P s.t. P*F and P*O are multiples of 128 and P divides B."""
    pf = 128 // math.gcd(128, F)
    po = 128 // math.gcd(128, O)
    P = (pf * po) // math.gcd(pf, po)
    if P < 1 or B % P != 0:
        return None
    # Keep the block-diagonal weights comfortably VMEM-resident.
    if (P * F) * (P * H) * itemsize > max_weight_bytes:
        return None
    if (P * H) * (P * O) * itemsize > max_weight_bytes:
        return None
    return P


def _mlp_kernel(x_ref, w1_ref, b1_ref, w2_ref, b2_ref, o_ref):
    # Hidden layer: MXU matmul with f32 accumulation, bias + ReLU on the VPU.
    h = jnp.dot(x_ref[...], w1_ref[...], preferred_element_type=jnp.float32)
    h = jnp.maximum(h + b1_ref[...].astype(jnp.float32), 0.0)
    # Output layer: h kept in f32 vregs (no VMEM round-trip, no bf16 downcast).
    out = jnp.dot(h, w2_ref[...].astype(jnp.float32),
                  preferred_element_type=jnp.float32)
    out = out + b2_ref[...].astype(jnp.float32)
    o_ref[...] = out.astype(o_ref.dtype)


def _call_mlp(xv, w1v, b1v, w2v, b2v, TB, num_tiles, out_dtype):
    R, Fp = xv.shape
    _, Hp = w1v.shape
    _, Op = w2v.shape
    itemsize = jnp.dtype(xv.dtype).itemsize
    w_itemsize = jnp.dtype(w1v.dtype).itemsize
    cost = pl.CostEstimate(
        flops=2 * R * (Fp * Hp + Hp * Op),
        transcendentals=0,
        bytes_accessed=R * (Fp + Op) * itemsize
        + (Fp * Hp + Hp + Hp * Op + Op) * w_itemsize,
    )
    return pl.pallas_call(
        _mlp_kernel,
        out_shape=jax.ShapeDtypeStruct((R, Op), out_dtype),
        grid_spec=pltpu.PrefetchScalarGridSpec(
            num_scalar_prefetch=0,
            grid=(num_tiles,),
            in_specs=[
                pl.BlockSpec((TB, Fp), lambda i: (i, 0)),   # x: one tile per TC
                pl.BlockSpec((Fp, Hp), lambda i: (0, 0)),   # weights stay resident
                pl.BlockSpec((1, Hp), lambda i: (0, 0)),
                pl.BlockSpec((Hp, Op), lambda i: (0, 0)),
                pl.BlockSpec((1, Op), lambda i: (0, 0)),
            ],
            out_specs=pl.BlockSpec((TB, Op), lambda i: (i, 0)),
        ),
        compiler_params=pltpu.CompilerParams(
            dimension_semantics=("parallel",)),   # v7x: one tile per TensorCore
        cost_estimate=cost,
    )(xv, w1v, b1v, w2v, b2v)


def simple_net_regression(x, w1, b1, w2, b2, *, num_tiles=None):
    """x: (B, F); w1: (F, H); b1: (1, H); w2: (H, O); b2: (1, O) -> (B, O)."""
    B, F = x.shape
    Fw, H = w1.shape
    Hw, O = w2.shape
    assert Fw == F and Hw == H
    b1 = b1.reshape(1, H)
    b2 = b2.reshape(1, O)

    if num_tiles is None:
        num_tiles = _default_num_tiles()
    num_tiles = max(1, int(num_tiles))

    P = _pack_factor(B, F, O, H)
    if P is not None:
        # Lane-dense packed path: pack P samples per row, block-diagonal weights.
        rows = B // P
        if rows % num_tiles != 0 or (rows // num_tiles) % 16 != 0:
            nt = 1                      # full-extent block is always legal
        else:
            nt = num_tiles
        TB = rows // nt

        eye_p1 = jnp.eye(P, dtype=w1.dtype)
        eye_p2 = jnp.eye(P, dtype=w2.dtype)
        w1p = jnp.kron(eye_p1, w1)          # (P*F, P*H) block-diagonal (exact)
        w2p = jnp.kron(eye_p2, w2)          # (P*H, P*O) block-diagonal (exact)
        b1p = jnp.tile(b1, (1, P))          # (1, P*H)
        b2p = jnp.tile(b2, (1, P))          # (1, P*O)
        xp = x.reshape(rows, P * F)         # contiguous re-view, lane-dense

        out = _call_mlp(xp, w1p, b1p, w2p, b2p, TB, nt, x.dtype)
        return out.reshape(B, O)

    # General fallback: plain (B, F) layout, pad batch to the tile grid.
    B_pad = _round_up(B, 8 * num_tiles)
    TB = B_pad // num_tiles
    x_p = x if B_pad == B else jnp.pad(x, ((0, B_pad - B), (0, 0)))
    out = _call_mlp(x_p, w1, b1, w2, b2, TB, num_tiles, x.dtype)
    return out if B_pad == B else out[:B]


def _init_linear(kw, kb, fan_in, fan_out, dtype=jnp.float32):
    # Mimic PyTorch's default U(-1/sqrt(fan_in), 1/sqrt(fan_in)) init.
    bound = 1.0 / math.sqrt(fan_in)
    w = jax.random.uniform(kw, (fan_in, fan_out), dtype, -bound, bound)  # (in, out)
    b = jax.random.uniform(kb, (1, fan_out), dtype, -bound, bound)
    return w, b


if __name__ == "__main__":
    # Shapes implied by the module: n_feature=16, n_hidden=32, n_output=4.
    B, n_feature, n_hidden, n_output = 1024, 16, 32, 4

    key = jax.random.PRNGKey(0)
    kx, k1w, k1b, k2w, k2b = jax.random.split(key, 5)

    x = jax.random.normal(kx, (B, n_feature), jnp.float32)
    w1, b1 = _init_linear(k1w, k1b, n_feature, n_hidden)
    w2, b2 = _init_linear(k2w, k2b, n_hidden, n_output)

    fwd = jax.jit(simple_net_regression)
    out = jax.block_until_ready(fwd(x, w1, b1, w2, b2))

    # Reference check in plain JAX (f32 path, tight tolerance).
    ref = jnp.maximum(x @ w1 + b1, 0.0) @ w2 + b2
    assert out.shape == (B, n_output)
    assert jnp.allclose(out, ref, atol=1e-5, rtol=1e-5)

    # bf16 activation/weight path: bf16 MXU inputs, f32 hidden + accumulation
    # inside the kernel, so only input-rounding error remains.
    xb, w1b, b1b, w2b, b2b = (a.astype(jnp.bfloat16) for a in (x, w1, b1, w2, b2))
    out_bf16 = jax.block_until_ready(
        jax.jit(simple_net_regression)(xb, w1b, b1b, w2b, b2b))
    assert out_bf16.shape == (B, n_output)
    assert jnp.allclose(out_bf16.astype(jnp.float32), ref, atol=5e-2, rtol=5e-2)

    print("KERNEL_OK")
</pallas_src>

<mosaic_0001>
module attributes {stable_mosaic.version = 11 : i64} {
  func.func @_mlp_kernel(%arg0: i32, %arg1: memref<32x512xf32, #tpu.memory_space<vmem>>, %arg2: memref<512x1024xf32, #tpu.memory_space<vmem>>, %arg3: memref<1x1024xf32, #tpu.memory_space<vmem>>, %arg4: memref<1024x128xf32, #tpu.memory_space<vmem>>, %arg5: memref<1x128xf32, #tpu.memory_space<vmem>>, %arg6: memref<32x128xf32, #tpu.memory_space<vmem>>) attributes {dimension_semantics = [#tpu.dimension_semantics<parallel>], iteration_bounds = array<i64: 1>, scalar_prefetch = 0 : i64, scratch_operands = 0 : i64, tpu.core_type = #tpu.core_type<tc>, window_params = [{transform_indices = @transform_0, window_bounds = array<i64: 32, 512>}, {pipeline_mode = #tpu.pipeline_mode<synchronous>, transform_indices = @transform_1, window_bounds = array<i64: 512, 1024>}, {pipeline_mode = #tpu.pipeline_mode<synchronous>, transform_indices = @transform_2, window_bounds = array<i64: 1, 1024>}, {pipeline_mode = #tpu.pipeline_mode<synchronous>, transform_indices = @transform_3, window_bounds = array<i64: 1024, 128>}, {pipeline_mode = #tpu.pipeline_mode<synchronous>, transform_indices = @transform_4, window_bounds = array<i64: 1, 128>}, {transform_indices = @transform_5, window_bounds = array<i64: 32, 128>}]} {
    %c0 = arith.constant 0 : index
    %c0_0 = arith.constant 0 : index
    %0 = vector.load %arg1[%c0, %c0_0] : memref<32x512xf32, #tpu.memory_space<vmem>>, vector<32x512xf32>
    %c0_1 = arith.constant 0 : index
    %c0_2 = arith.constant 0 : index
    %1 = vector.load %arg2[%c0_1, %c0_2] : memref<512x1024xf32, #tpu.memory_space<vmem>>, vector<512x1024xf32>
    %cst = arith.constant dense<0.000000e+00> : vector<32x1024xf32>
    %2 = tpu.matmul %0, %1, %cst {dimension_numbers = #tpu.dot_dimension_numbers<[1], [0], [0], [1], [0, 0, 1, 1], [], []>} : vector<32x512xf32>, vector<512x1024xf32>, vector<32x1024xf32> -> vector<32x1024xf32>
    %c0_3 = arith.constant 0 : index
    %c0_4 = arith.constant 0 : index
    %3 = vector.load %arg3[%c0_3, %c0_4] : memref<1x1024xf32, #tpu.memory_space<vmem>>, vector<1x1024xf32>
    %4 = vector.broadcast %3 : vector<1x1024xf32> to vector<32x1024xf32>
    %5 = arith.addf %2, %4 : vector<32x1024xf32>
    %cst_5 = arith.constant 0.000000e+00 : f32
    %6 = vector.broadcast %cst_5 : f32 to vector<32x1024xf32>
    %7 = arith.maximumf %5, %6 : vector<32x1024xf32>
    %c0_6 = arith.constant 0 : index
    %c0_7 = arith.constant 0 : index
    %8 = vector.load %arg4[%c0_6, %c0_7] : memref<1024x128xf32, #tpu.memory_space<vmem>>, vector<1024x128xf32>
    %cst_8 = arith.constant dense<0.000000e+00> : vector<32x128xf32>
    %9 = tpu.matmul %7, %8, %cst_8 {dimension_numbers = #tpu.dot_dimension_numbers<[1], [0], [0], [1], [0, 0, 1, 1], [], []>} : vector<32x1024xf32>, vector<1024x128xf32>, vector<32x128xf32> -> vector<32x128xf32>
    %c0_9 = arith.constant 0 : index
    %c0_10 = arith.constant 0 : index
    %10 = vector.load %arg5[%c0_9, %c0_10] : memref<1x128xf32, #tpu.memory_space<vmem>>, vector<1x128xf32>
    %11 = vector.broadcast %10 : vector<1x128xf32> to vector<32x128xf32>
    %12 = arith.addf %9, %11 : vector<32x128xf32>
    %c0_11 = arith.constant 0 : index
    %c0_12 = arith.constant 0 : index
    %13 = vector.load %arg6[%c0_11, %c0_12] : memref<32x128xf32, #tpu.memory_space<vmem>>, vector<32x128xf32>
    tpu.vector_store %arg6[%c0_11, %c0_12], %12 {strides = array<i32>} : memref<32x128xf32, #tpu.memory_space<vmem>>, vector<32x128xf32>,
    return
  }
  func.func @transform_0(%arg0: i32) -> (i32, i32) {
    %c0_i32 = arith.constant 0 : i32
    %c0_i32_0 = arith.constant 0 : i32
    return %arg0, %c0_i32 : i32, i32
  }
  func.func @transform_1(%arg0: i32) -> (i32, i32) {
    %c0_i32 = arith.constant 0 : i32
    %c0_i32_0 = arith.constant 0 : i32
    %c0_i32_1 = arith.constant 0 : i32
    return %c0_i32, %c0_i32_0 : i32, i32
  }
  func.func @transform_2(%arg0: i32) -> (i32, i32) {
    %c0_i32 = arith.constant 0 : i32
    %c0_i32_0 = arith.constant 0 : i32
    %c0_i32_1 = arith.constant 0 : i32
    return %c0_i32, %c0_i32_0 : i32, i32
  }
  func.func @transform_3(%arg0: i32) -> (i32, i32) {
    %c0_i32 = arith.constant 0 : i32
    %c0_i32_0 = arith.constant 0 : i32
    %c0_i32_1 = arith.constant 0 : i32
    return %c0_i32, %c0_i32_0 : i32, i32
  }
  func.func @transform_4(%arg0: i32) -> (i32, i32) {
    %c0_i32 = arith.constant 0 : i32
    %c0_i32_0 = arith.constant 0 : i32
    %c0_i32_1 = arith.constant 0 : i32
    return %c0_i32, %c0_i32_0 : i32, i32
  }
  func.func @transform_5(%arg0: i32) -> (i32, i32) {
    %c0_i32 = arith.constant 0 : i32
    %c0_i32_0 = arith.constant 0 : i32
    return %arg0, %c0_i32 : i32, i32
  }
}

</mosaic_0001>

<bundles_post_ra>
// kernel: simple_net_regression.1
= control target key start
LH: loop header
LB: loop body
LE: loop exit
PB: predicated region body
PF: predicated region fallthrough
CT: control target
= control target key end

     0   :  { %s4487_s1 = inlined_call_operand.vmem [shape: f32[512,1024], index: 1, kind: input, shape index: {}]   ;;  %s4488_s0 = inlined_call_operand.vmem [shape: f32[32,512], index: 0, kind: input, shape index: {}]   ;;  %s4489_s3 = inlined_call_operand.vmem [shape: f32[1024,128], index: 3, kind: input, shape index: {}]   ;;  %s4490_s2 = inlined_call_operand.vmem [shape: f32[1,1024], index: 2, kind: input, shape index: {}]   ;;  %s4491_s4 = inlined_call_operand.vmem [shape: f32[1,128], index: 4, kind: input, shape index: {}]   ;;  %s4492_s5 = inlined_call_operand.vmem [shape: f32[32,128], index: 5, kind: output, shape index: {}]  }
   0x1   :  { %v156_v0 = vld [vmem:[%s4487_s1 + $0x3c0] sm:$0xff] }
   0x2   :  { %v284_v1 = vld [vmem:[%s4487_s1 + $0x7c0] sm:$0xff]  ;;  %566 = vmatpush.msra.mxu0 %v156_v0 }
   0x3   :  { %v412_v2 = vld [vmem:[%s4487_s1 + $0xbc0] sm:$0xff]  ;;  %595 = vmatpush.msra.mxu1 %v284_v1  ;;  %v2145_v1 = vld [vmem:[%s4488_s0 + $0x8] sm:$0xff] }
   0x4   :  { %v540_v3 = vld [vmem:[%s4487_s1 + $0xfc0] sm:$0xff]  ;;  %624 = vmatpush.msra.mxu2 %v412_v2  ;;  %v2150_v2 = vld [vmem:[%s4488_s0 + $0x10] sm:$0xff] }
   0x5   :  { %v148_v4 = vld [vmem:[%s4487_s1 + $0x380] sm:$0xff]  ;;  %653 = vmatpush.msra.mxu3 %v540_v3  ;;  %v2155_v3 = vld [vmem:[%s4488_s0 + $0x18] sm:$0xff] }
   0x6   :  { %v276_v5 = vld [vmem:[%s4487_s1 + $0x780] sm:$0xff]  ;;  %567 = vmatpush.msra.mxu0 %v148_v4  ;;  %v413_v4 = vld [vmem:[%s4487_s1 + $0xbc8] sm:$0xff] }
   0x7   :  { %v404_v6 = vld [vmem:[%s4487_s1 + $0xb80] sm:$0xff]  ;;  %596 = vmatpush.msra.mxu1 %v276_v5  ;;  %v157_v5 = vld [vmem:[%s4487_s1 + $0x3c8] sm:$0xff] }
   0x8   :  { %v532_v7 = vld [vmem:[%s4487_s1 + $0xf80] sm:$0xff]  ;;  %625 = vmatpush.msra.mxu2 %v404_v6  ;;  %v285_v6 = vld [vmem:[%s4487_s1 + $0x7c8] sm:$0xff] }
   0x9   :  { %v140_v8 = vld [vmem:[%s4487_s1 + $0x340] sm:$0xff]  ;;  %654 = vmatpush.msra.mxu3 %v532_v7  ;;  %v541_v7 = vld [vmem:[%s4487_s1 + $0xfc8] sm:$0xff] }
   0xa   :  { %v268_v9 = vld [vmem:[%s4487_s1 + $0x740] sm:$0xff]  ;;  %568 = vmatpush.msra.mxu0 %v140_v8  ;;  %v405_v8 = vld [vmem:[%s4487_s1 + $0xb88] sm:$0xff] }
   0xb   :  { %v396_v10 = vld [vmem:[%s4487_s1 + $0xb40] sm:$0xff]  ;;  %597 = vmatpush.msra.mxu1 %v268_v9  ;;  %v149_v9 = vld [vmem:[%s4487_s1 + $0x388] sm:$0xff] }
   0xc   :  { %v524_v11 = vld [vmem:[%s4487_s1 + $0xf40] sm:$0xff]  ;;  %626 = vmatpush.msra.mxu2 %v396_v10  ;;  %v277_v10 = vld [vmem:[%s4487_s1 + $0x788] sm:$0xff] }
   0xd   :  { %v132_v12 = vld [vmem:[%s4487_s1 + $0x300] sm:$0xff]  ;;  %655 = vmatpush.msra.mxu3 %v524_v11  ;;  %v533_v11 = vld [vmem:[%s4487_s1 + $0xf88] sm:$0xff] }
   0xe   :  { %v260_v13 = vld [vmem:[%s4487_s1 + $0x700] sm:$0xff]  ;;  %569 = vmatpush.msra.mxu0 %v132_v12  ;;  %v397_v12 = vld [vmem:[%s4487_s1 + $0xb48] sm:$0xff] }
   0xf   :  { %v388_v14 = vld [vmem:[%s4487_s1 + $0xb00] sm:$0xff]  ;;  %598 = vmatpush.msra.mxu1 %v260_v13  ;;  %v141_v13 = vld [vmem:[%s4487_s1 + $0x348] sm:$0xff] }
  0x10   :  { %v516_v15 = vld [vmem:[%s4487_s1 + $0xf00] sm:$0xff]  ;;  %627 = vmatpush.msra.mxu2 %v388_v14  ;;  %v269_v14 = vld [vmem:[%s4487_s1 + $0x748] sm:$0xff] }
  0x11   :  { %v124_v16 = vld [vmem:[%s4487_s1 + $0x2c0] sm:$0xff]  ;;  %656 = vmatpush.msra.mxu3 %v516_v15  ;;  %v525_v15 = vld [vmem:[%s4487_s1 + $0xf48] sm:$0xff] }
  0x12   :  { %v252_v17 = vld [vmem:[%s4487_s1 + $0x6c0] sm:$0xff]  ;;  %570 = vmatpush.msra.mxu0 %v124_v16  ;;  %v389_v16 = vld [vmem:[%s4487_s1 + $0xb08] sm:$0xff] }
  0x13   :  { %v380_v18 = vld [vmem:[%s4487_s1 + $0xac0] sm:$0xff]  ;;  %599 = vmatpush.msra.mxu1 %v252_v17  ;;  %v133_v17 = vld [vmem:[%s4487_s1 + $0x308] sm:$0xff] }
  0x14   :  { %v508_v19 = vld [vmem:[%s4487_s1 + $0xec0] sm:$0xff]  ;;  %628 = vmatpush.msra.mxu2 %v380_v18  ;;  %v261_v18 = vld [vmem:[%s4487_s1 + $0x708] sm:$0xff] }
  0x15   :  { %v116_v20 = vld [vmem:[%s4487_s1 + $0x280] sm:$0xff]  ;;  %657 = vmatpush.msra.mxu3 %v508_v19  ;;  %v517_v19 = vld [vmem:[%s4487_s1 + $0xf08] sm:$0xff] }
  0x16   :  { %v244_v21 = vld [vmem:[%s4487_s1 + $0x680] sm:$0xff]  ;;  %571 = vmatpush.msra.mxu0 %v116_v20 }
  0x17   :  { %v372_v22 = vld [vmem:[%s4487_s1 + $0xa80] sm:$0xff]  ;;  %600 = vmatpush.msra.mxu1 %v244_v21  ;;  %v2217_v21 = vld [vmem:[%s4488_s0 + $0x28] sm:$0xff] }
  0x18   :  { %v500_v23 = vld [vmem:[%s4487_s1 + $0xe80] sm:$0xff]  ;;  %629 = vmatpush.msra.mxu2 %v372_v22  ;;  %v2222_v22 = vld [vmem:[%s4488_s0 + $0x30] sm:$0xff] }
  0x19   :  { %v108_v24 = vld [vmem:[%s4487_s1 + $0x240] sm:$0xff]  ;;  %658 = vmatpush.msra.mxu3 %v500_v23  ;;  %v2227_v23 = vld [vmem:[%s4488_s0 + $0x38] sm:$0xff] }
  0x1a   :  { %v236_v25 = vld [vmem:[%s4487_s1 + $0x640] sm:$0xff]  ;;  %572 = vmatpush.msra.mxu0 %v108_v24  ;;  %v381_v24 = vld [vmem:[%s4487_s1 + $0xac8] sm:$0xff] }
  0x1b   :  { %v364_v26 = vld [vmem:[%s4487_s1 + $0xa40] sm:$0xff]  ;;  %601 = vmatpush.msra.mxu1 %v236_v25  ;;  %v125_v25 = vld [vmem:[%s4487_s1 + $0x2c8] sm:$0xff] }
  0x1c   :  { %v492_v27 = vld [vmem:[%s4487_s1 + $0xe40] sm:$0xff]  ;;  %630 = vmatpush.msra.mxu2 %v364_v26  ;;  %v253_v26 = vld [vmem:[%s4487_s1 + $0x6c8] sm:$0xff] }
  0x1d   :  { %v100_v28 = vld [vmem:[%s4487_s1 + $0x200] sm:$0xff]  ;;  %659 = vmatpush.msra.mxu3 %v492_v27  ;;  %v509_v27 = vld [vmem:[%s4487_s1 + $0xec8] sm:$0xff] }
  0x1e   :  { %v228_v29 = vld [vmem:[%s4487_s1 + $0x600] sm:$0xff]  ;;  %573 = vmatpush.msra.mxu0 %v100_v28  ;;  %v373_v28 = vld [vmem:[%s4487_s1 + $0xa88] sm:$0xff] }
  0x1f   :  { %v356_v30 = vld [vmem:[%s4487_s1 + $0xa00] sm:$0xff]  ;;  %602 = vmatpush.msra.mxu1 %v228_v29  ;;  %v117_v29 = vld [vmem:[%s4487_s1 + $0x288] sm:$0xff] }
  0x20   :  { %v484_v31 = vld [vmem:[%s4487_s1 + $0xe00] sm:$0xff]  ;;  %631 = vmatpush.msra.mxu2 %v356_v30  ;;  %v245_v30 = vld [vmem:[%s4487_s1 + $0x688] sm:$0xff] }
  0x21   :  { %v92_v32 = vld [vmem:[%s4487_s1 + $0x1c0] sm:$0xff]  ;;  %660 = vmatpush.msra.mxu3 %v484_v31  ;;  %v501_v31 = vld [vmem:[%s4487_s1 + $0xe88] sm:$0xff] }
  0x22   :  { %v220_v33 = vld [vmem:[%s4487_s1 + $0x5c0] sm:$0xff]  ;;  %574 = vmatpush.msra.mxu0 %v92_v32  ;;  %v365_v32 = vld [vmem:[%s4487_s1 + $0xa48] sm:$0xff] }
  0x23   :  { %v348_v34 = vld [vmem:[%s4487_s1 + $0x9c0] sm:$0xff]  ;;  %603 = vmatpush.msra.mxu1 %v220_v33  ;;  %v109_v33 = vld [vmem:[%s4487_s1 + $0x248] sm:$0xff] }
  0x24   :  { %v476_v35 = vld [vmem:[%s4487_s1 + $0xdc0] sm:$0xff]  ;;  %632 = vmatpush.msra.mxu2 %v348_v34  ;;  %v237_v34 = vld [vmem:[%s4487_s1 + $0x648] sm:$0xff] }
  0x25   :  { %v84_v36 = vld [vmem:[%s4487_s1 + $0x180] sm:$0xff]  ;;  %661 = vmatpush.msra.mxu3 %v476_v35  ;;  %v493_v35 = vld [vmem:[%s4487_s1 + $0xe48] sm:$0xff] }
  0x26   :  { %v212_v37 = vld [vmem:[%s4487_s1 + $0x580] sm:$0xff]  ;;  %575 = vmatpush.msra.mxu0 %v84_v36  ;;  %v357_v36 = vld [vmem:[%s4487_s1 + $0xa08] sm:$0xff] }
  0x27   :  { %v340_v38 = vld [vmem:[%s4487_s1 + $0x980] sm:$0xff]  ;;  %604 = vmatpush.msra.mxu1 %v212_v37  ;;  %v101_v37 = vld [vmem:[%s4487_s1 + $0x208] sm:$0xff] }
  0x28   :  { %v468_v39 = vld [vmem:[%s4487_s1 + $0xd80] sm:$0xff]  ;;  %633 = vmatpush.msra.mxu2 %v340_v38  ;;  %v229_v38 = vld [vmem:[%s4487_s1 + $0x608] sm:$0xff] }
  0x29   :  { %v76_v40 = vld [vmem:[%s4487_s1 + $0x140] sm:$0xff]  ;;  %662 = vmatpush.msra.mxu3 %v468_v39  ;;  %v485_v39 = vld [vmem:[%s4487_s1 + $0xe08] sm:$0xff] }
  0x2a   :  { %v204_v41 = vld [vmem:[%s4487_s1 + $0x540] sm:$0xff]  ;;  %576 = vmatpush.msra.mxu0 %v76_v40 }
  0x2b   :  { %v332_v42 = vld [vmem:[%s4487_s1 + $0x940] sm:$0xff]  ;;  %605 = vmatpush.msra.mxu1 %v204_v41  ;;  %v2289_v41 = vld [vmem:[%s4488_s0 + $0x48] sm:$0xff] }
  0x2c   :  { %v460_v43 = vld [vmem:[%s4487_s1 + $0xd40] sm:$0xff]  ;;  %634 = vmatpush.msra.mxu2 %v332_v42  ;;  %v2294_v42 = vld [vmem:[%s4488_s0 + $0x50] sm:$0xff] }
  0x2d   :  { %v68_v44 = vld [vmem:[%s4487_s1 + $0x100] sm:$0xff]  ;;  %663 = vmatpush.msra.mxu3 %v460_v43  ;;  %v2299_v43 = vld [vmem:[%s4488_s0 + $0x58] sm:$0xff] }
  0x2e   :  { %v196_v45 = vld [vmem:[%s4487_s1 + $0x500] sm:$0xff]  ;;  %577 = vmatpush.msra.mxu0 %v68_v44  ;;  %v349_v44 = vld [vmem:[%s4487_s1 + $0x9c8] sm:$0xff] }
  0x2f   :  { %v324_v46 = vld [vmem:[%s4487_s1 + $0x900] sm:$0xff]  ;;  %606 = vmatpush.msra.mxu1 %v196_v45  ;;  %v93_v45 = vld [vmem:[%s4487_s1 + $0x1c8] sm:$0xff] }
  0x30   :  { %v452_v47 = vld [vmem:[%s4487_s1 + $0xd00] sm:$0xff]  ;;  %635 = vmatpush.msra.mxu2 %v324_v46  ;;  %v221_v46 = vld [vmem:[%s4487_s1 + $0x5c8] sm:$0xff] }
  0x31   :  { %v60_v48 = vld [vmem:[%s4487_s1 + $0xc0] sm:$0xff]  ;;  %664 = vmatpush.msra.mxu3 %v452_v47  ;;  %v477_v47 = vld [vmem:[%s4487_s1 + $0xdc8] sm:$0xff] }
  0x32   :  { %v188_v49 = vld [vmem:[%s4487_s1 + $0x4c0] sm:$0xff]  ;;  %578 = vmatpush.msra.mxu0 %v60_v48  ;;  %v341_v48 = vld [vmem:[%s4487_s1 + $0x988] sm:$0xff] }
  0x33   :  { %v316_v50 = vld [vmem:[%s4487_s1 + $0x8c0] sm:$0xff]  ;;  %607 = vmatpush.msra.mxu1 %v188_v49  ;;  %v85_v49 = vld [vmem:[%s4487_s1 + $0x188] sm:$0xff] }
  0x34   :  { %v444_v51 = vld [vmem:[%s4487_s1 + $0xcc0] sm:$0xff]  ;;  %636 = vmatpush.msra.mxu2 %v316_v50  ;;  %v213_v50 = vld [vmem:[%s4487_s1 + $0x588] sm:$0xff] }
  0x35   :  { %v52_v52 = vld [vmem:[%s4487_s1 + $0x80] sm:$0xff]  ;;  %665 = vmatpush.msra.mxu3 %v444_v51  ;;  %v469_v51 = vld [vmem:[%s4487_s1 + $0xd88] sm:$0xff] }
  0x36   :  { %v180_v53 = vld [vmem:[%s4487_s1 + $0x480] sm:$0xff]  ;;  %579 = vmatpush.msra.mxu0 %v52_v52  ;;  %v333_v52 = vld [vmem:[%s4487_s1 + $0x948] sm:$0xff] }
  0x37   :  { %v308_v54 = vld [vmem:[%s4487_s1 + $0x880] sm:$0xff]  ;;  %608 = vmatpush.msra.mxu1 %v180_v53  ;;  %v77_v53 = vld [vmem:[%s4487_s1 + $0x148] sm:$0xff] }
  0x38   :  { %v436_v55 = vld [vmem:[%s4487_s1 + $0xc80] sm:$0xff]  ;;  %637 = vmatpush.msra.mxu2 %v308_v54  ;;  %v205_v54 = vld [vmem:[%s4487_s1 + $0x548] sm:$0xff] }
  0x39   :  { %v44_v56 = vld [vmem:[%s4487_s1 + $0x40] sm:$0xff]  ;;  %666 = vmatpush.msra.mxu3 %v436_v55  ;;  %v461_v55 = vld [vmem:[%s4487_s1 + $0xd48] sm:$0xff] }
  0x3a   :  { %v172_v57 = vld [vmem:[%s4487_s1 + $0x440] sm:$0xff]  ;;  %580 = vmatpush.msra.mxu0 %v44_v56  ;;  %v325_v56 = vld [vmem:[%s4487_s1 + $0x908] sm:$0xff] }
  0x3b   :  { %v300_v58 = vld [vmem:[%s4487_s1 + $0x840] sm:$0xff]  ;;  %609 = vmatpush.msra.mxu1 %v172_v57  ;;  %v69_v57 = vld [vmem:[%s4487_s1 + $0x108] sm:$0xff] }
  0x3c   :  { %v428_v59 = vld [vmem:[%s4487_s1 + $0xc40] sm:$0xff]  ;;  %638 = vmatpush.msra.mxu2 %v300_v58  ;;  %v197_v58 = vld [vmem:[%s4487_s1 + $0x508] sm:$0xff] }
  0x3d   :  { %v36_v60 = vld [vmem:[%s4487_s1] sm:$0xff]  ;;  %667 = vmatpush.msra.mxu3 %v428_v59  ;;  %v453_v59 = vld [vmem:[%s4487_s1 + $0xd08] sm:$0xff] }
  0x3e   :  { %v164_v61 = vld [vmem:[%s4487_s1 + $0x400] sm:$0xff]  ;;  %581 = vmatpush.msra.mxu0 %v36_v60 }
  0x3f   :  { %v292_v62 = vld [vmem:[%s4487_s1 + $0x800] sm:$0xff]  ;;  %610 = vmatpush.msra.mxu1 %v164_v61  ;;  %v2361_v61 = vld [vmem:[%s4488_s0 + $0x68] sm:$0xff] }
  0x40   :  { %v420_v63 = vld [vmem:[%s4487_s1 + $0xc00] sm:$0xff]  ;;  %639 = vmatpush.msra.mxu2 %v292_v62  ;;  %611 = vmatmul.f32.vlgmr.msra.gmra.mxu1 %v2145_v1  ;;  %v2366_v62 = vld [vmem:[%s4488_s0 + $0x70] sm:$0xff] }
  0x41   :  { %v2140_v0 = vld [vmem:[%s4488_s0] sm:$0xff]  ;;  %668 = vmatpush.msra.mxu3 %v420_v63  ;;  %640 = vmatmul.f32.vlgmr.msra.gmra.mxu2 %v2150_v2  ;;  %v2371_v63 = vld [vmem:[%s4488_s0 + $0x78] sm:$0xff] }
  0x42   :  { %582 = vmatmul.f32.vlgmr.msra.gmra.mxu0 %v2140_v0  ;;  %669 = vmatmul.f32.vlgmr.msra.gmra.mxu3 %v2155_v3  ;;  %v2212_v20 = vld [vmem:[%s4488_s0 + $0x20] sm:$0xff] }
  0x43   :  { %740 = vmatpush.msrb.mxu2 %v413_v4  ;;  %682 = vmatpush.msrb.mxu0 %v157_v5  ;;  %v2284_v40 = vld [vmem:[%s4488_s0 + $0x40] sm:$0xff]  ;;  %v317_v4 = vld [vmem:[%s4487_s1 + $0x8c8] sm:$0xff] }
  0x44   :  { %711 = vmatpush.msrb.mxu1 %v285_v6  ;;  %769 = vmatpush.msrb.mxu3 %v541_v7  ;;  %v2356_v60 = vld [vmem:[%s4488_s0 + $0x60] sm:$0xff]  ;;  %v61_v5 = vld [vmem:[%s4487_s1 + $0xc8] sm:$0xff] }
  0x45   :  { %741 = vmatpush.msrb.mxu2 %v405_v8  ;;  %683 = vmatpush.msrb.mxu0 %v149_v9  ;;  %v189_v6 = vld [vmem:[%s4487_s1 + $0x4c8] sm:$0xff] }
  0x46   :  { %712 = vmatpush.msrb.mxu1 %v277_v10  ;;  %770 = vmatpush.msrb.mxu3 %v533_v11  ;;  %v445_v7 = vld [vmem:[%s4487_s1 + $0xcc8] sm:$0xff] }
  0x47   :  { %742 = vmatpush.msrb.mxu2 %v397_v12  ;;  %684 = vmatpush.msrb.mxu0 %v141_v13  ;;  %v309_v8 = vld [vmem:[%s4487_s1 + $0x888] sm:$0xff] }
  0x48   :  { %713 = vmatpush.msrb.mxu1 %v269_v14  ;;  %771 = vmatpush.msrb.mxu3 %v525_v15  ;;  %v53_v9 = vld [vmem:[%s4487_s1 + $0x88] sm:$0xff] }
  0x49   :  { %743 = vmatpush.msrb.mxu2 %v389_v16  ;;  %685 = vmatpush.msrb.mxu0 %v133_v17  ;;  %v181_v10 = vld [vmem:[%s4487_s1 + $0x488] sm:$0xff] }
  0x4a   :  { %714 = vmatpush.msrb.mxu1 %v261_v18  ;;  %772 = vmatpush.msrb.mxu3 %v517_v19  ;;  %v437_v11 = vld [vmem:[%s4487_s1 + $0xc88] sm:$0xff] }
  0x4b   :  { %585 = vmatmul.f32.gmra.mxu0 %v2212_v20  ;;  %614 = vmatmul.f32.gmra.mxu1 %v2217_v21  ;;  %v301_v12 = vld [vmem:[%s4487_s1 + $0x848] sm:$0xff] }
  0x4c   :  { %643 = vmatmul.f32.gmra.mxu2 %v2222_v22  ;;  %672 = vmatmul.f32.gmra.mxu3 %v2227_v23  ;;  %v45_v13 = vld [vmem:[%s4487_s1 + $0x48] sm:$0xff] }
  0x4d   :  { %744 = vmatpush.msrb.mxu2 %v381_v24  ;;  %686 = vmatpush.msrb.mxu0 %v125_v25  ;;  %v173_v14 = vld [vmem:[%s4487_s1 + $0x448] sm:$0xff]  ;;  %v414_v24 = vld [vmem:[%s4487_s1 + $0xbd0] sm:$0xff] }
  0x4e   :  { %715 = vmatpush.msrb.mxu1 %v253_v26  ;;  %773 = vmatpush.msrb.mxu3 %v509_v27  ;;  %v429_v15 = vld [vmem:[%s4487_s1 + $0xc48] sm:$0xff]  ;;  %v158_v25 = vld [vmem:[%s4487_s1 + $0x3d0] sm:$0xff] }
  0x4f   :  { %745 = vmatpush.msrb.mxu2 %v373_v28  ;;  %687 = vmatpush.msrb.mxu0 %v117_v29  ;;  %v293_v16 = vld [vmem:[%s4487_s1 + $0x808] sm:$0xff]  ;;  %v286_v26 = vld [vmem:[%s4487_s1 + $0x7d0] sm:$0xff] }
  0x50   :  { %716 = vmatpush.msrb.mxu1 %v245_v30  ;;  %774 = vmatpush.msrb.mxu3 %v501_v31  ;;  %v37_v17 = vld [vmem:[%s4487_s1 + $0x8] sm:$0xff]  ;;  %v542_v27 = vld [vmem:[%s4487_s1 + $0xfd0] sm:$0xff] }
  0x51   :  { %746 = vmatpush.msrb.mxu2 %v365_v32  ;;  %688 = vmatpush.msrb.mxu0 %v109_v33  ;;  %v165_v18 = vld [vmem:[%s4487_s1 + $0x408] sm:$0xff]  ;;  %v406_v28 = vld [vmem:[%s4487_s1 + $0xb90] sm:$0xff] }
  0x52   :  { %717 = vmatpush.msrb.mxu1 %v237_v34  ;;  %775 = vmatpush.msrb.mxu3 %v493_v35  ;;  %v421_v19 = vld [vmem:[%s4487_s1 + $0xc08] sm:$0xff]  ;;  %v150_v29 = vld [vmem:[%s4487_s1 + $0x390] sm:$0xff] }
  0x53   :  { %747 = vmatpush.msrb.mxu2 %v357_v36  ;;  %689 = vmatpush.msrb.mxu0 %v101_v37  ;;  %v278_v30 = vld [vmem:[%s4487_s1 + $0x790] sm:$0xff] }
  0x54   :  { %718 = vmatpush.msrb.mxu1 %v229_v38  ;;  %776 = vmatpush.msrb.mxu3 %v485_v39  ;;  %v534_v31 = vld [vmem:[%s4487_s1 + $0xf90] sm:$0xff] }
  0x55   :  { %588 = vmatmul.f32.gmra.mxu0 %v2284_v40  ;;  %617 = vmatmul.f32.gmra.mxu1 %v2289_v41  ;;  %v398_v32 = vld [vmem:[%s4487_s1 + $0xb50] sm:$0xff] }
  0x56   :  { %646 = vmatmul.f32.gmra.mxu2 %v2294_v42  ;;  %675 = vmatmul.f32.gmra.mxu3 %v2299_v43  ;;  %v142_v33 = vld [vmem:[%s4487_s1 + $0x350] sm:$0xff] }
  0x57   :  { %748 = vmatpush.msrb.mxu2 %v349_v44  ;;  %690 = vmatpush.msrb.mxu0 %v93_v45  ;;  %v270_v34 = vld [vmem:[%s4487_s1 + $0x750] sm:$0xff] }
  0x58   :  { %719 = vmatpush.msrb.mxu1 %v221_v46  ;;  %777 = vmatpush.msrb.mxu3 %v477_v47  ;;  %v526_v35 = vld [vmem:[%s4487_s1 + $0xf50] sm:$0xff] }
  0x59   :  { %749 = vmatpush.msrb.mxu2 %v341_v48  ;;  %691 = vmatpush.msrb.mxu0 %v85_v49  ;;  %v390_v36 = vld [vmem:[%s4487_s1 + $0xb10] sm:$0xff] }
  0x5a   :  { %720 = vmatpush.msrb.mxu1 %v213_v50  ;;  %778 = vmatpush.msrb.mxu3 %v469_v51  ;;  %v134_v37 = vld [vmem:[%s4487_s1 + $0x310] sm:$0xff] }
  0x5b   :  { %750 = vmatpush.msrb.mxu2 %v333_v52  ;;  %692 = vmatpush.msrb.mxu0 %v77_v53  ;;  %v262_v38 = vld [vmem:[%s4487_s1 + $0x710] sm:$0xff] }
  0x5c   :  { %721 = vmatpush.msrb.mxu1 %v205_v54  ;;  %779 = vmatpush.msrb.mxu3 %v461_v55  ;;  %v518_v39 = vld [vmem:[%s4487_s1 + $0xf10] sm:$0xff] }
  0x5d   :  { %751 = vmatpush.msrb.mxu2 %v325_v56  ;;  %693 = vmatpush.msrb.mxu0 %v69_v57  ;;  %v382_v44 = vld [vmem:[%s4487_s1 + $0xad0] sm:$0xff] }
  0x5e   :  { %722 = vmatpush.msrb.mxu1 %v197_v58  ;;  %780 = vmatpush.msrb.mxu3 %v453_v59  ;;  %v126_v45 = vld [vmem:[%s4487_s1 + $0x2d0] sm:$0xff] }
  0x5f   :  { %591 = vmatmul.f32.gmra.mxu0 %v2356_v60  ;;  %620 = vmatmul.f32.gmra.mxu1 %v2361_v61  ;;  %v254_v46 = vld [vmem:[%s4487_s1 + $0x6d0] sm:$0xff] }
  0x60   :  { %649 = vmatmul.f32.gmra.mxu2 %v2366_v62  ;;  %678 = vmatmul.f32.gmra.mxu3 %v2371_v63  ;;  %v510_v47 = vld [vmem:[%s4487_s1 + $0xed0] sm:$0xff] }
  0x61   :  { %752 = vmatpush.msrb.mxu2 %v317_v4  ;;  %694 = vmatpush.msrb.mxu0 %v61_v5  ;;  %v374_v48 = vld [vmem:[%s4487_s1 + $0xa90] sm:$0xff] }
  0x62   :  { %723 = vmatpush.msrb.mxu1 %v189_v6  ;;  %781 = vmatpush.msrb.mxu3 %v445_v7  ;;  %v118_v49 = vld [vmem:[%s4487_s1 + $0x290] sm:$0xff] }
  0x63   :  { %753 = vmatpush.msrb.mxu2 %v309_v8  ;;  %695 = vmatpush.msrb.mxu0 %v53_v9  ;;  %v246_v50 = vld [vmem:[%s4487_s1 + $0x690] sm:$0xff] }
  0x64   :  { %724 = vmatpush.msrb.mxu1 %v181_v10  ;;  %782 = vmatpush.msrb.mxu3 %v437_v11  ;;  %v502_v51 = vld [vmem:[%s4487_s1 + $0xe90] sm:$0xff] }
  0x65   :  { %754 = vmatpush.msrb.mxu2 %v301_v12  ;;  %696 = vmatpush.msrb.mxu0 %v45_v13  ;;  %v366_v52 = vld [vmem:[%s4487_s1 + $0xa50] sm:$0xff] }
  0x66   :  { %725 = vmatpush.msrb.mxu1 %v173_v14  ;;  %783 = vmatpush.msrb.mxu3 %v429_v15  ;;  %v110_v53 = vld [vmem:[%s4487_s1 + $0x250] sm:$0xff] }
  0x67   :  { %755 = vmatpush.msrb.mxu2 %v293_v16  ;;  %697 = vmatpush.msrb.mxu0 %v37_v17  ;;  %v238_v54 = vld [vmem:[%s4487_s1 + $0x650] sm:$0xff] }
  0x68   :  { %726 = vmatpush.msrb.mxu1 %v165_v18  ;;  %784 = vmatpush.msrb.mxu3 %v421_v19  ;;  %v494_v55 = vld [vmem:[%s4487_s1 + $0xe50] sm:$0xff] }
  0x69   :  { %698 = vmatmul.f32.vlgmr.msrb.gmra.mxu0 %v2140_v0  ;;  %727 = vmatmul.f32.vlgmr.msrb.gmra.mxu1 %v2145_v1  ;;  %v358_v56 = vld [vmem:[%s4487_s1 + $0xa10] sm:$0xff] }
  0x6a   :  { %756 = vmatmul.f32.vlgmr.msrb.gmra.mxu2 %v2150_v2  ;;  %785 = vmatmul.f32.vlgmr.msrb.gmra.mxu3 %v2155_v3  ;;  %v102_v57 = vld [vmem:[%s4487_s1 + $0x210] sm:$0xff] }
  0x6b   :  { %856 = vmatpush.msra.mxu2 %v414_v24  ;;  %798 = vmatpush.msra.mxu0 %v158_v25  ;;  %v230_v58 = vld [vmem:[%s4487_s1 + $0x610] sm:$0xff] }
  0x6c   :  { %827 = vmatpush.msra.mxu1 %v286_v26  ;;  %885 = vmatpush.msra.mxu3 %v542_v27  ;;  %v486_v59 = vld [vmem:[%s4487_s1 + $0xe10] sm:$0xff] }
  0x6d   :  { %857 = vmatpush.msra.mxu2 %v406_v28  ;;  %799 = vmatpush.msra.mxu0 %v150_v29  ;;  %v350_v4 = vld [vmem:[%s4487_s1 + $0x9d0] sm:$0xff] }
  0x6e   :  { %828 = vmatpush.msra.mxu1 %v278_v30  ;;  %886 = vmatpush.msra.mxu3 %v534_v31  ;;  %v94_v5 = vld [vmem:[%s4487_s1 + $0x1d0] sm:$0xff] }
  0x6f   :  { %858 = vmatpush.msra.mxu2 %v398_v32  ;;  %800 = vmatpush.msra.mxu0 %v142_v33  ;;  %v222_v6 = vld [vmem:[%s4487_s1 + $0x5d0] sm:$0xff] }
  0x70   :  { %829 = vmatpush.msra.mxu1 %v270_v34  ;;  %887 = vmatpush.msra.mxu3 %v526_v35  ;;  %v478_v7 = vld [vmem:[%s4487_s1 + $0xdd0] sm:$0xff] }
  0x71   :  { %859 = vmatpush.msra.mxu2 %v390_v36  ;;  %801 = vmatpush.msra.mxu0 %v134_v37  ;;  %v342_v8 = vld [vmem:[%s4487_s1 + $0x990] sm:$0xff] }
  0x72   :  { %830 = vmatpush.msra.mxu1 %v262_v38  ;;  %888 = vmatpush.msra.mxu3 %v518_v39  ;;  %v86_v9 = vld [vmem:[%s4487_s1 + $0x190] sm:$0xff] }
  0x73   :  { %701 = vmatmul.f32.gmra.mxu0 %v2212_v20  ;;  %730 = vmatmul.f32.gmra.mxu1 %v2217_v21  ;;  %v214_v10 = vld [vmem:[%s4487_s1 + $0x590] sm:$0xff] }
  0x74   :  { %759 = vmatmul.f32.gmra.mxu2 %v2222_v22  ;;  %788 = vmatmul.f32.gmra.mxu3 %v2227_v23  ;;  %v470_v11 = vld [vmem:[%s4487_s1 + $0xd90] sm:$0xff] }
  0x75   :  { %860 = vmatpush.msra.mxu2 %v382_v44  ;;  %802 = vmatpush.msra.mxu0 %v126_v45  ;;  %v334_v12 = vld [vmem:[%s4487_s1 + $0x950] sm:$0xff]  ;;  %v415_v44 = vld [vmem:[%s4487_s1 + $0xbd8] sm:$0xff] }
  0x76   :  { %831 = vmatpush.msra.mxu1 %v254_v46  ;;  %889 = vmatpush.msra.mxu3 %v510_v47  ;;  %v78_v13 = vld [vmem:[%s4487_s1 + $0x150] sm:$0xff]  ;;  %v159_v45 = vld [vmem:[%s4487_s1 + $0x3d8] sm:$0xff] }
  0x77   :  { %861 = vmatpush.msra.mxu2 %v374_v48  ;;  %803 = vmatpush.msra.mxu0 %v118_v49  ;;  %v206_v14 = vld [vmem:[%s4487_s1 + $0x550] sm:$0xff]  ;;  %v287_v46 = vld [vmem:[%s4487_s1 + $0x7d8] sm:$0xff] }
  0x78   :  { %832 = vmatpush.msra.mxu1 %v246_v50  ;;  %890 = vmatpush.msra.mxu3 %v502_v51  ;;  %v462_v15 = vld [vmem:[%s4487_s1 + $0xd50] sm:$0xff]  ;;  %v543_v47 = vld [vmem:[%s4487_s1 + $0xfd8] sm:$0xff] }
  0x79   :  { %862 = vmatpush.msra.mxu2 %v366_v52  ;;  %804 = vmatpush.msra.mxu0 %v110_v53  ;;  %v326_v16 = vld [vmem:[%s4487_s1 + $0x910] sm:$0xff]  ;;  %v407_v48 = vld [vmem:[%s4487_s1 + $0xb98] sm:$0xff] }
  0x7a   :  { %833 = vmatpush.msra.mxu1 %v238_v54  ;;  %891 = vmatpush.msra.mxu3 %v494_v55  ;;  %v70_v17 = vld [vmem:[%s4487_s1 + $0x110] sm:$0xff]  ;;  %v151_v49 = vld [vmem:[%s4487_s1 + $0x398] sm:$0xff] }
  0x7b   :  { %863 = vmatpush.msra.mxu2 %v358_v56  ;;  %805 = vmatpush.msra.mxu0 %v102_v57  ;;  %v198_v18 = vld [vmem:[%s4487_s1 + $0x510] sm:$0xff]  ;;  %v279_v50 = vld [vmem:[%s4487_s1 + $0x798] sm:$0xff] }
  0x7c   :  { %834 = vmatpush.msra.mxu1 %v230_v58  ;;  %892 = vmatpush.msra.mxu3 %v486_v59  ;;  %v454_v19 = vld [vmem:[%s4487_s1 + $0xd10] sm:$0xff]  ;;  %v535_v51 = vld [vmem:[%s4487_s1 + $0xf98] sm:$0xff] }
  0x7d   :  { %704 = vmatmul.f32.gmra.mxu0 %v2284_v40  ;;  %733 = vmatmul.f32.gmra.mxu1 %v2289_v41  ;;  %v318_v24 = vld [vmem:[%s4487_s1 + $0x8d0] sm:$0xff]  ;;  %v399_v52 = vld [vmem:[%s4487_s1 + $0xb58] sm:$0xff] }
  0x7e   :  { %762 = vmatmul.f32.gmra.mxu2 %v2294_v42  ;;  %791 = vmatmul.f32.gmra.mxu3 %v2299_v43  ;;  %v62_v25 = vld [vmem:[%s4487_s1 + $0xd0] sm:$0xff]  ;;  %v143_v53 = vld [vmem:[%s4487_s1 + $0x358] sm:$0xff] }
  0x7f   :  { %864 = vmatpush.msra.mxu2 %v350_v4  ;;  %806 = vmatpush.msra.mxu0 %v94_v5  ;;  %v190_v26 = vld [vmem:[%s4487_s1 + $0x4d0] sm:$0xff]  ;;  %v271_v54 = vld [vmem:[%s4487_s1 + $0x758] sm:$0xff] }
  0x80   :  { %835 = vmatpush.msra.mxu1 %v222_v6  ;;  %893 = vmatpush.msra.mxu3 %v478_v7  ;;  %v446_v27 = vld [vmem:[%s4487_s1 + $0xcd0] sm:$0xff]  ;;  %v527_v55 = vld [vmem:[%s4487_s1 + $0xf58] sm:$0xff] }
  0x81   :  { %865 = vmatpush.msra.mxu2 %v342_v8  ;;  %807 = vmatpush.msra.mxu0 %v86_v9  ;;  %v310_v28 = vld [vmem:[%s4487_s1 + $0x890] sm:$0xff]  ;;  %v391_v56 = vld [vmem:[%s4487_s1 + $0xb18] sm:$0xff] }
  0x82   :  { %836 = vmatpush.msra.mxu1 %v214_v10  ;;  %894 = vmatpush.msra.mxu3 %v470_v11  ;;  %v54_v29 = vld [vmem:[%s4487_s1 + $0x90] sm:$0xff]  ;;  %v135_v57 = vld [vmem:[%s4487_s1 + $0x318] sm:$0xff] }
  0x83   :  { %866 = vmatpush.msra.mxu2 %v334_v12  ;;  %808 = vmatpush.msra.mxu0 %v78_v13  ;;  %v182_v30 = vld [vmem:[%s4487_s1 + $0x490] sm:$0xff]  ;;  %v263_v58 = vld [vmem:[%s4487_s1 + $0x718] sm:$0xff] }
  0x84   :  { %837 = vmatpush.msra.mxu1 %v206_v14  ;;  %895 = vmatpush.msra.mxu3 %v462_v15  ;;  %v438_v31 = vld [vmem:[%s4487_s1 + $0xc90] sm:$0xff]  ;;  %v519_v59 = vld [vmem:[%s4487_s1 + $0xf18] sm:$0xff] }
  0x85   :  { %867 = vmatpush.msra.mxu2 %v326_v16  ;;  %809 = vmatpush.msra.mxu0 %v70_v17  ;;  %v302_v32 = vld [vmem:[%s4487_s1 + $0x850] sm:$0xff]  ;;  %v383_v4 = vld [vmem:[%s4487_s1 + $0xad8] sm:$0xff] }
  0x86   :  { %838 = vmatpush.msra.mxu1 %v198_v18  ;;  %896 = vmatpush.msra.mxu3 %v454_v19  ;;  %v46_v33 = vld [vmem:[%s4487_s1 + $0x50] sm:$0xff]  ;;  %v127_v5 = vld [vmem:[%s4487_s1 + $0x2d8] sm:$0xff] }
  0x87   :  { %707 = vmatmul.f32.gmra.mxu0 %v2356_v60  ;;  %736 = vmatmul.f32.gmra.mxu1 %v2361_v61  ;;  %v174_v34 = vld [vmem:[%s4487_s1 + $0x450] sm:$0xff]  ;;  %v255_v6 = vld [vmem:[%s4487_s1 + $0x6d8] sm:$0xff] }
  0x88   :  { %765 = vmatmul.f32.gmra.mxu2 %v2366_v62  ;;  %794 = vmatmul.f32.gmra.mxu3 %v2371_v63  ;;  %v430_v35 = vld [vmem:[%s4487_s1 + $0xc50] sm:$0xff]  ;;  %v511_v7 = vld [vmem:[%s4487_s1 + $0xed8] sm:$0xff] }
  0x89   :  { %868 = vmatpush.msra.mxu2 %v318_v24  ;;  %810 = vmatpush.msra.mxu0 %v62_v25  ;;  %v294_v36 = vld [vmem:[%s4487_s1 + $0x810] sm:$0xff]  ;;  %v375_v8 = vld [vmem:[%s4487_s1 + $0xa98] sm:$0xff] }
  0x8a   :  { %839 = vmatpush.msra.mxu1 %v190_v26  ;;  %897 = vmatpush.msra.mxu3 %v446_v27  ;;  %v38_v37 = vld [vmem:[%s4487_s1 + $0x10] sm:$0xff]  ;;  %v119_v9 = vld [vmem:[%s4487_s1 + $0x298] sm:$0xff] }
  0x8b   :  { %869 = vmatpush.msra.mxu2 %v310_v28  ;;  %811 = vmatpush.msra.mxu0 %v54_v29  ;;  %v166_v38 = vld [vmem:[%s4487_s1 + $0x410] sm:$0xff]  ;;  %v247_v10 = vld [vmem:[%s4487_s1 + $0x698] sm:$0xff] }
  0x8c   :  { %840 = vmatpush.msra.mxu1 %v182_v30  ;;  %898 = vmatpush.msra.mxu3 %v438_v31  ;;  %v422_v39 = vld [vmem:[%s4487_s1 + $0xc10] sm:$0xff]  ;;  %v503_v11 = vld [vmem:[%s4487_s1 + $0xe98] sm:$0xff] }
  0x8d   :  { %870 = vmatpush.msra.mxu2 %v302_v32  ;;  %812 = vmatpush.msra.mxu0 %v46_v33  ;;  %v367_v12 = vld [vmem:[%s4487_s1 + $0xa58] sm:$0xff] }
  0x8e   :  { %841 = vmatpush.msra.mxu1 %v174_v34  ;;  %899 = vmatpush.msra.mxu3 %v430_v35  ;;  %v111_v13 = vld [vmem:[%s4487_s1 + $0x258] sm:$0xff] }
  0x8f   :  { %871 = vmatpush.msra.mxu2 %v294_v36  ;;  %813 = vmatpush.msra.mxu0 %v38_v37  ;;  %v239_v14 = vld [vmem:[%s4487_s1 + $0x658] sm:$0xff] }
  0x90   :  { %842 = vmatpush.msra.mxu1 %v166_v38  ;;  %900 = vmatpush.msra.mxu3 %v422_v39  ;;  %v495_v15 = vld [vmem:[%s4487_s1 + $0xe58] sm:$0xff] }
  0x91   :  { %814 = vmatmul.f32.vlgmr.msra.gmra.mxu0 %v2140_v0  ;;  %843 = vmatmul.f32.vlgmr.msra.gmra.mxu1 %v2145_v1  ;;  %v359_v16 = vld [vmem:[%s4487_s1 + $0xa18] sm:$0xff] }
  0x92   :  { %872 = vmatmul.f32.vlgmr.msra.gmra.mxu2 %v2150_v2  ;;  %901 = vmatmul.f32.vlgmr.msra.gmra.mxu3 %v2155_v3  ;;  %v103_v17 = vld [vmem:[%s4487_s1 + $0x218] sm:$0xff] }
  0x93   :  { %972 = vmatpush.msrb.mxu2 %v415_v44  ;;  %914 = vmatpush.msrb.mxu0 %v159_v45  ;;  %v231_v18 = vld [vmem:[%s4487_s1 + $0x618] sm:$0xff] }
  0x94   :  { %943 = vmatpush.msrb.mxu1 %v287_v46  ;;  %1001 = vmatpush.msrb.mxu3 %v543_v47  ;;  %v487_v19 = vld [vmem:[%s4487_s1 + $0xe18] sm:$0xff] }
  0x95   :  { %973 = vmatpush.msrb.mxu2 %v407_v48  ;;  %915 = vmatpush.msrb.mxu0 %v151_v49  ;;  %v351_v24 = vld [vmem:[%s4487_s1 + $0x9d8] sm:$0xff] }
  0x96   :  { %944 = vmatpush.msrb.mxu1 %v279_v50  ;;  %1002 = vmatpush.msrb.mxu3 %v535_v51  ;;  %v95_v25 = vld [vmem:[%s4487_s1 + $0x1d8] sm:$0xff] }
  0x97   :  { %974 = vmatpush.msrb.mxu2 %v399_v52  ;;  %916 = vmatpush.msrb.mxu0 %v143_v53  ;;  %v223_v26 = vld [vmem:[%s4487_s1 + $0x5d8] sm:$0xff] }
  0x98   :  { %945 = vmatpush.msrb.mxu1 %v271_v54  ;;  %1003 = vmatpush.msrb.mxu3 %v527_v55  ;;  %v479_v27 = vld [vmem:[%s4487_s1 + $0xdd8] sm:$0xff] }
  0x99   :  { %975 = vmatpush.msrb.mxu2 %v391_v56  ;;  %917 = vmatpush.msrb.mxu0 %v135_v57  ;;  %v343_v28 = vld [vmem:[%s4487_s1 + $0x998] sm:$0xff] }
  0x9a   :  { %946 = vmatpush.msrb.mxu1 %v263_v58  ;;  %1004 = vmatpush.msrb.mxu3 %v519_v59  ;;  %v87_v29 = vld [vmem:[%s4487_s1 + $0x198] sm:$0xff] }
  0x9b   :  { %817 = vmatmul.f32.gmra.mxu0 %v2212_v20  ;;  %846 = vmatmul.f32.gmra.mxu1 %v2217_v21  ;;  %v215_v30 = vld [vmem:[%s4487_s1 + $0x598] sm:$0xff] }
  0x9c   :  { %875 = vmatmul.f32.gmra.mxu2 %v2222_v22  ;;  %904 = vmatmul.f32.gmra.mxu3 %v2227_v23  ;;  %v471_v31 = vld [vmem:[%s4487_s1 + $0xd98] sm:$0xff] }
  0x9d   :  { %976 = vmatpush.msrb.mxu2 %v383_v4  ;;  %918 = vmatpush.msrb.mxu0 %v127_v5  ;;  %v335_v32 = vld [vmem:[%s4487_s1 + $0x958] sm:$0xff]  ;;  %v416_v4 = vld [vmem:[%s4487_s1 + $0xbe0] sm:$0xff] }
  0x9e   :  { %947 = vmatpush.msrb.mxu1 %v255_v6  ;;  %1005 = vmatpush.msrb.mxu3 %v511_v7  ;;  %v79_v33 = vld [vmem:[%s4487_s1 + $0x158] sm:$0xff]  ;;  %v160_v5 = vld [vmem:[%s4487_s1 + $0x3e0] sm:$0xff] }
  0x9f   :  { %977 = vmatpush.msrb.mxu2 %v375_v8  ;;  %919 = vmatpush.msrb.mxu0 %v119_v9  ;;  %v207_v34 = vld [vmem:[%s4487_s1 + $0x558] sm:$0xff]  ;;  %v288_v6 = vld [vmem:[%s4487_s1 + $0x7e0] sm:$0xff] }
  0xa0   :  { %948 = vmatpush.msrb.mxu1 %v247_v10  ;;  %1006 = vmatpush.msrb.mxu3 %v503_v11  ;;  %v463_v35 = vld [vmem:[%s4487_s1 + $0xd58] sm:$0xff]  ;;  %v544_v7 = vld [vmem:[%s4487_s1 + $0xfe0] sm:$0xff] }
  0xa1   :  { %978 = vmatpush.msrb.mxu2 %v367_v12  ;;  %920 = vmatpush.msrb.mxu0 %v111_v13  ;;  %v327_v36 = vld [vmem:[%s4487_s1 + $0x918] sm:$0xff]  ;;  %v408_v8 = vld [vmem:[%s4487_s1 + $0xba0] sm:$0xff] }
  0xa2   :  { %949 = vmatpush.msrb.mxu1 %v239_v14  ;;  %1007 = vmatpush.msrb.mxu3 %v495_v15  ;;  %v71_v37 = vld [vmem:[%s4487_s1 + $0x118] sm:$0xff]  ;;  %v144_v9 = vld [vmem:[%s4487_s1 + $0x360] sm:$0xff] }
  0xa3   :  { %979 = vmatpush.msrb.mxu2 %v359_v16  ;;  %921 = vmatpush.msrb.mxu0 %v103_v17  ;;  %v199_v38 = vld [vmem:[%s4487_s1 + $0x518] sm:$0xff]  ;;  %v272_v10 = vld [vmem:[%s4487_s1 + $0x760] sm:$0xff] }
  0xa4   :  { %950 = vmatpush.msrb.mxu1 %v231_v18  ;;  %1008 = vmatpush.msrb.mxu3 %v487_v19  ;;  %v455_v39 = vld [vmem:[%s4487_s1 + $0xd18] sm:$0xff]  ;;  %v528_v11 = vld [vmem:[%s4487_s1 + $0xf60] sm:$0xff] }
  0xa5   :  { %820 = vmatmul.f32.gmra.mxu0 %v2284_v40  ;;  %849 = vmatmul.f32.gmra.mxu1 %v2289_v41  ;;  %v319_v44 = vld [vmem:[%s4487_s1 + $0x8d8] sm:$0xff]  ;;  %v392_v12 = vld [vmem:[%s4487_s1 + $0xb20] sm:$0xff] }
  0xa6   :  { %878 = vmatmul.f32.gmra.mxu2 %v2294_v42  ;;  %907 = vmatmul.f32.gmra.mxu3 %v2299_v43  ;;  %v63_v45 = vld [vmem:[%s4487_s1 + $0xd8] sm:$0xff]  ;;  %v136_v13 = vld [vmem:[%s4487_s1 + $0x320] sm:$0xff] }
  0xa7   :  { %980 = vmatpush.msrb.mxu2 %v351_v24  ;;  %922 = vmatpush.msrb.mxu0 %v95_v25  ;;  %v191_v46 = vld [vmem:[%s4487_s1 + $0x4d8] sm:$0xff]  ;;  %v264_v15 = vld [vmem:[%s4487_s1 + $0x720] sm:$0xff] }
  0xa8   :  { %951 = vmatpush.msrb.mxu1 %v223_v26  ;;  %1009 = vmatpush.msrb.mxu3 %v479_v27  ;;  %v447_v47 = vld [vmem:[%s4487_s1 + $0xcd8] sm:$0xff]  ;;  %v520_v16 = vld [vmem:[%s4487_s1 + $0xf20] sm:$0xff] }
  0xa9   :  { %981 = vmatpush.msrb.mxu2 %v343_v28  ;;  %923 = vmatpush.msrb.mxu0 %v87_v29  ;;  %v311_v48 = vld [vmem:[%s4487_s1 + $0x898] sm:$0xff]  ;;  %v384_v18 = vld [vmem:[%s4487_s1 + $0xae0] sm:$0xff] }
  0xaa   :  { %952 = vmatpush.msrb.mxu1 %v215_v30  ;;  %1010 = vmatpush.msrb.mxu3 %v471_v31  ;;  %v55_v49 = vld [vmem:[%s4487_s1 + $0x98] sm:$0xff]  ;;  %v128_v19 = vld [vmem:[%s4487_s1 + $0x2e0] sm:$0xff] }
  0xab   :  { %982 = vmatpush.msrb.mxu2 %v335_v32  ;;  %924 = vmatpush.msrb.mxu0 %v79_v33  ;;  %v183_v50 = vld [vmem:[%s4487_s1 + $0x498] sm:$0xff]  ;;  %v256_v24 = vld [vmem:[%s4487_s1 + $0x6e0] sm:$0xff] }
  0xac   :  { %953 = vmatpush.msrb.mxu1 %v207_v34  ;;  %1011 = vmatpush.msrb.mxu3 %v463_v35  ;;  %v439_v51 = vld [vmem:[%s4487_s1 + $0xc98] sm:$0xff]  ;;  %v512_v25 = vld [vmem:[%s4487_s1 + $0xee0] sm:$0xff] }
  0xad   :  { %983 = vmatpush.msrb.mxu2 %v327_v36  ;;  %925 = vmatpush.msrb.mxu0 %v71_v37  ;;  %v303_v52 = vld [vmem:[%s4487_s1 + $0x858] sm:$0xff]  ;;  %v376_v26 = vld [vmem:[%s4487_s1 + $0xaa0] sm:$0xff] }
  0xae   :  { %954 = vmatpush.msrb.mxu1 %v199_v38  ;;  %1012 = vmatpush.msrb.mxu3 %v455_v39  ;;  %v47_v53 = vld [vmem:[%s4487_s1 + $0x58] sm:$0xff]  ;;  %v112_v28 = vld [vmem:[%s4487_s1 + $0x260] sm:$0xff] }
  0xaf   :  { %823 = vmatmul.f32.gmra.mxu0 %v2356_v60  ;;  %852 = vmatmul.f32.gmra.mxu1 %v2361_v61  ;;  %v175_v54 = vld [vmem:[%s4487_s1 + $0x458] sm:$0xff]  ;;  %v240_v29 = vld [vmem:[%s4487_s1 + $0x660] sm:$0xff] }
  0xb0   :  { %881 = vmatmul.f32.gmra.mxu2 %v2366_v62  ;;  %910 = vmatmul.f32.gmra.mxu3 %v2371_v63  ;;  %v431_v55 = vld [vmem:[%s4487_s1 + $0xc58] sm:$0xff]  ;;  %v496_v30 = vld [vmem:[%s4487_s1 + $0xe60] sm:$0xff] }
  0xb1   :  { %984 = vmatpush.msrb.mxu2 %v319_v44  ;;  %926 = vmatpush.msrb.mxu0 %v63_v45  ;;  %v295_v56 = vld [vmem:[%s4487_s1 + $0x818] sm:$0xff]  ;;  %v360_v32 = vld [vmem:[%s4487_s1 + $0xa20] sm:$0xff] }
  0xb2   :  { %955 = vmatpush.msrb.mxu1 %v191_v46  ;;  %1013 = vmatpush.msrb.mxu3 %v447_v47  ;;  %v39_v57 = vld [vmem:[%s4487_s1 + $0x18] sm:$0xff]  ;;  %v104_v33 = vld [vmem:[%s4487_s1 + $0x220] sm:$0xff] }
  0xb3   :  { %985 = vmatpush.msrb.mxu2 %v311_v48  ;;  %927 = vmatpush.msrb.mxu0 %v55_v49  ;;  %v167_v58 = vld [vmem:[%s4487_s1 + $0x418] sm:$0xff]  ;;  %v232_v35 = vld [vmem:[%s4487_s1 + $0x620] sm:$0xff] }
  0xb4   :  { %956 = vmatpush.msrb.mxu1 %v183_v50  ;;  %1014 = vmatpush.msrb.mxu3 %v439_v51  ;;  %v423_v59 = vld [vmem:[%s4487_s1 + $0xc18] sm:$0xff]  ;;  %v488_v36 = vld [vmem:[%s4487_s1 + $0xe20] sm:$0xff] }
  0xb5   :  { %986 = vmatpush.msrb.mxu2 %v303_v52  ;;  %928 = vmatpush.msrb.mxu0 %v47_v53  ;;  %v352_v38 = vld [vmem:[%s4487_s1 + $0x9e0] sm:$0xff] }
  0xb6   :  { %957 = vmatpush.msrb.mxu1 %v175_v54  ;;  %1015 = vmatpush.msrb.mxu3 %v431_v55  ;;  %v96_v39 = vld [vmem:[%s4487_s1 + $0x1e0] sm:$0xff] }
  0xb7   :  { %987 = vmatpush.msrb.mxu2 %v295_v56  ;;  %929 = vmatpush.msrb.mxu0 %v39_v57  ;;  %v224_v44 = vld [vmem:[%s4487_s1 + $0x5e0] sm:$0xff] }
  0xb8   :  { %958 = vmatpush.msrb.mxu1 %v167_v58  ;;  %1016 = vmatpush.msrb.mxu3 %v423_v59  ;;  %v480_v45 = vld [vmem:[%s4487_s1 + $0xde0] sm:$0xff] }
  0xb9   :  { %930 = vmatmul.f32.vlgmr.msrb.gmra.mxu0 %v2140_v0  ;;  %959 = vmatmul.f32.vlgmr.msrb.gmra.mxu1 %v2145_v1  ;;  %v152_v0 = vld [vmem:[%s4487_s1 + $0x3a0] sm:$0xff] }
  0xba   :  { %988 = vmatmul.f32.vlgmr.msrb.gmra.mxu2 %v2150_v2  ;;  %1017 = vmatmul.f32.vlgmr.msrb.gmra.mxu3 %v2155_v3  ;;  %v280_v1 = vld [vmem:[%s4487_s1 + $0x7a0] sm:$0xff] }
  0xbb   :  { %1088 = vmatpush.msra.mxu2 %v416_v4  ;;  %1030 = vmatpush.msra.mxu0 %v160_v5  ;;  %v536_v2 = vld [vmem:[%s4487_s1 + $0xfa0] sm:$0xff] }
  0xbc   :  { %1059 = vmatpush.msra.mxu1 %v288_v6  ;;  %1117 = vmatpush.msra.mxu3 %v544_v7  ;;  %v400_v3 = vld [vmem:[%s4487_s1 + $0xb60] sm:$0xff] }
  0xbd   :  { %1089 = vmatpush.msra.mxu2 %v408_v8  ;;  %1031 = vmatpush.msra.mxu0 %v152_v0  ;;  %v2895_v17 = vpop.f32.mrf.mxu1  ;;  %v344_v46 = vld [vmem:[%s4487_s1 + $0x9a0] sm:$0xff] }
  0xbe   :  { %1060 = vmatpush.msra.mxu1 %v280_v1  ;;  %1118 = vmatpush.msra.mxu3 %v536_v2  ;;  %v80_v48 = vld [vmem:[%s4487_s1 + $0x160] sm:$0xff] }
  0xbf   :  { %v2887_v14 = vpop.f32.mrf.mxu0  ;;  %1090 = vmatpush.msra.mxu2 %v400_v3  ;;  %1032 = vmatpush.msra.mxu0 %v144_v9  ;;  %v208_v49 = vld [vmem:[%s4487_s1 + $0x560] sm:$0xff] }
  0xc0   :  { %1061 = vmatpush.msra.mxu1 %v272_v10  ;;  %1119 = vmatpush.msra.mxu3 %v528_v11  ;;  %v464_v50 = vld [vmem:[%s4487_s1 + $0xd60] sm:$0xff] }
  0xc1   :  { %1091 = vmatpush.msra.mxu2 %v392_v12  ;;  %1033 = vmatpush.msra.mxu0 %v136_v13  ;;  %v328_v52 = vld [vmem:[%s4487_s1 + $0x920] sm:$0xff] }
  0xc2   :  { %1062 = vmatpush.msra.mxu1 %v264_v15  ;;  %1120 = vmatpush.msra.mxu3 %v520_v16  ;;  %v72_v53 = vld [vmem:[%s4487_s1 + $0x120] sm:$0xff]  ;;  %v417_v15 = vld [vmem:[%s4487_s1 + $0xbe8] sm:$0xff] }
  0xc3   :  { %933 = vmatmul.f32.gmra.mxu0 %v2212_v20  ;;  %962 = vmatmul.f32.gmra.mxu1 %v2217_v21  ;;  %v120_v20 = vld [vmem:[%s4487_s1 + $0x2a0] sm:$0xff]  ;;  %v161_v16 = vld [vmem:[%s4487_s1 + $0x3e8] sm:$0xff] }
  0xc4   :  { %991 = vmatmul.f32.gmra.mxu2 %v2222_v22  ;;  %1020 = vmatmul.f32.gmra.mxu3 %v2227_v23  ;;  %v248_v21 = vld [vmem:[%s4487_s1 + $0x6a0] sm:$0xff]  ;;  %v2925_v27 = vpop.f32.mrf.mxu2 }
  0xc5   :  { %1092 = vmatpush.msra.mxu2 %v384_v18  ;;  %1034 = vmatpush.msra.mxu0 %v128_v19  ;;  %v504_v22 = vld [vmem:[%s4487_s1 + $0xea0] sm:$0xff]  ;;  %v2939_v31 = vpop.f32.mrf.mxu3  ;;  %v3092_v19 = vld [vmem:[%s4488_s0 + $0x8] sm:$0xff] }
  0xc6   :  { %1063 = vmatpush.msra.mxu1 %v256_v24  ;;  %1121 = vmatpush.msra.mxu3 %v512_v25  ;;  %v368_v23 = vld [vmem:[%s4487_s1 + $0xa60] sm:$0xff]  ;;  %v289_v24 = vld [vmem:[%s4487_s1 + $0x7e8] sm:$0xff] }
  0xc7   :  { %1093 = vmatpush.msra.mxu2 %v376_v26  ;;  %1035 = vmatpush.msra.mxu0 %v120_v20  ;;  %v200_v55 = vld [vmem:[%s4487_s1 + $0x520] sm:$0xff]  ;;  %v545_v25 = vld [vmem:[%s4487_s1 + $0xfe8] sm:$0xff]  ;;  %v3104_v26 = vld [vmem:[%s4488_s0 + $0x10] sm:$0xff] }
  0xc8   :  { %1064 = vmatpush.msra.mxu1 %v248_v21  ;;  %1122 = vmatpush.msra.mxu3 %v504_v22  ;;  %v2947_v34 = vpop.f32.mrf.mxu0  ;;  %v2955_v37 = vpop.f32.mrf.mxu1  ;;  %v456_v56 = vld [vmem:[%s4487_s1 + $0xd20] sm:$0xff]  ;;  %v3110_v20 = vld [vmem:[%s4488_s0 + $0x18] sm:$0xff]  ;;  %v409_v21 = vld [vmem:[%s4487_s1 + $0xba8] sm:$0xff] }
  0xc9   :  { %1094 = vmatpush.msra.mxu2 %v368_v23  ;;  %1036 = vmatpush.msra.mxu0 %v112_v28  ;;  %v320_v58 = vld [vmem:[%s4487_s1 + $0x8e0] sm:$0xff]  ;;  %v153_v22 = vld [vmem:[%s4487_s1 + $0x3a8] sm:$0xff] }
  0xca   :  { %1065 = vmatpush.msra.mxu1 %v240_v29  ;;  %1123 = vmatpush.msra.mxu3 %v496_v30  ;;  %v64_v59 = vld [vmem:[%s4487_s1 + $0xe0] sm:$0xff]  ;;  %v281_v23 = vld [vmem:[%s4487_s1 + $0x7a8] sm:$0xff] }
  0xcb   :  { %1095 = vmatpush.msra.mxu2 %v360_v32  ;;  %1037 = vmatpush.msra.mxu0 %v104_v33  ;;  %v192_v4 = vld [vmem:[%s4487_s1 + $0x4e0] sm:$0xff]  ;;  %v537_v28 = vld [vmem:[%s4487_s1 + $0xfa8] sm:$0xff] }
  0xcc   :  { %1066 = vmatpush.msra.mxu1 %v232_v35  ;;  %1124 = vmatpush.msra.mxu3 %v488_v36  ;;  %v448_v5 = vld [vmem:[%s4487_s1 + $0xce0] sm:$0xff]  ;;  %v401_v30 = vld [vmem:[%s4487_s1 + $0xb68] sm:$0xff] }
  0xcd   :  { %936 = vmatmul.f32.gmra.mxu0 %v2284_v40  ;;  %965 = vmatmul.f32.gmra.mxu1 %v2289_v41  ;;  %v88_v40 = vld [vmem:[%s4487_s1 + $0x1a0] sm:$0xff]  ;;  %v145_v32 = vld [vmem:[%s4487_s1 + $0x368] sm:$0xff] }
  0xce   :  { %994 = vmatmul.f32.gmra.mxu2 %v2294_v42  ;;  %1023 = vmatmul.f32.gmra.mxu3 %v2299_v43  ;;  %v216_v41 = vld [vmem:[%s4487_s1 + $0x5a0] sm:$0xff]  ;;  %v273_v33 = vld [vmem:[%s4487_s1 + $0x768] sm:$0xff] }
  0xcf   :  { %1096 = vmatpush.msra.mxu2 %v352_v38  ;;  %1038 = vmatpush.msra.mxu0 %v96_v39  ;;  %v472_v42 = vld [vmem:[%s4487_s1 + $0xda0] sm:$0xff]  ;;  %v2985_v47 = vpop.f32.mrf.mxu2  ;;  %v2999_v51 = vpop.f32.mrf.mxu3  ;;  %v529_v35 = vld [vmem:[%s4487_s1 + $0xf68] sm:$0xff] }
  0xd0   :  { %1067 = vmatpush.msra.mxu1 %v224_v44  ;;  %1125 = vmatpush.msra.mxu3 %v480_v45  ;;  %v336_v43 = vld [vmem:[%s4487_s1 + $0x960] sm:$0xff]  ;;  %v393_v38 = vld [vmem:[%s4487_s1 + $0xb28] sm:$0xff] }
  0xd1   :  { %1097 = vmatpush.msra.mxu2 %v344_v46  ;;  %1039 = vmatpush.msra.mxu0 %v88_v40  ;;  %v312_v6 = vld [vmem:[%s4487_s1 + $0x8a0] sm:$0xff]  ;;  %v137_v39 = vld [vmem:[%s4487_s1 + $0x328] sm:$0xff] }
  0xd2   :  { %1068 = vmatpush.msra.mxu1 %v216_v41  ;;  %1126 = vmatpush.msra.mxu3 %v472_v42  ;;  %v3007_v54 = vpop.f32.mrf.mxu0  ;;  %v3015_v57 = vpop.f32.mrf.mxu1  ;;  %v48_v8 = vld [vmem:[%s4487_s1 + $0x60] sm:$0xff]  ;;  %v265_v45 = vld [vmem:[%s4487_s1 + $0x728] sm:$0xff] }
  0xd3   :  { %1098 = vmatpush.msra.mxu2 %v336_v43  ;;  %1040 = vmatpush.msra.mxu0 %v80_v48  ;;  %v176_v0 = vld [vmem:[%s4487_s1 + $0x460] sm:$0xff]  ;;  %v521_v46 = vld [vmem:[%s4487_s1 + $0xf28] sm:$0xff] }
  0xd4   :  { %1069 = vmatpush.msra.mxu1 %v208_v49  ;;  %1127 = vmatpush.msra.mxu3 %v464_v50  ;;  %v432_v1 = vld [vmem:[%s4487_s1 + $0xc60] sm:$0xff]  ;;  %v385_v41 = vld [vmem:[%s4487_s1 + $0xae8] sm:$0xff] }
  0xd5   :  { %1099 = vmatpush.msra.mxu2 %v328_v52  ;;  %1041 = vmatpush.msra.mxu0 %v72_v53  ;;  %v296_v3 = vld [vmem:[%s4487_s1 + $0x820] sm:$0xff]  ;;  %v129_v42 = vld [vmem:[%s4487_s1 + $0x2e8] sm:$0xff]  ;;  %v3184_v52 = vld [vmem:[%s4488_s0 + $0x30] sm:$0xff] }
  0xd6   :  { %1070 = vmatpush.msra.mxu1 %v200_v55  ;;  %1128 = vmatpush.msra.mxu3 %v456_v56  ;;  %v40_v9 = vld [vmem:[%s4487_s1 + $0x20] sm:$0xff]  ;;  %v3172_v48 = vld [vmem:[%s4488_s0 + $0x28] sm:$0xff]  ;;  %v3190_v53 = vld [vmem:[%s4488_s0 + $0x38] sm:$0xff] }
  0xd7   :  { %939 = vmatmul.f32.gmra.mxu0 %v2356_v60  ;;  %968 = vmatmul.f32.gmra.mxu1 %v2361_v61  ;;  %v56_v60 = vld [vmem:[%s4487_s1 + $0xa0] sm:$0xff]  ;;  %v257_v49 = vld [vmem:[%s4487_s1 + $0x6e8] sm:$0xff] }
  0xd8   :  { %997 = vmatmul.f32.gmra.mxu2 %v2366_v62  ;;  %1026 = vmatmul.f32.gmra.mxu3 %v2371_v63  ;;  %v184_v61 = vld [vmem:[%s4487_s1 + $0x4a0] sm:$0xff]  ;;  %v513_v50 = vld [vmem:[%s4487_s1 + $0xee8] sm:$0xff] }
  0xd9   :  { %1100 = vmatpush.msra.mxu2 %v320_v58  ;;  %1042 = vmatpush.msra.mxu0 %v64_v59  ;;  %v440_v62 = vld [vmem:[%s4487_s1 + $0xca0] sm:$0xff]  ;;  %v3045_v7 = vpop.f32.mrf.mxu2  ;;  %v3059_v2 = vpop.f32.mrf.mxu3  ;;  %v377_v55 = vld [vmem:[%s4487_s1 + $0xaa8] sm:$0xff] }
  0xda   :  { %4493 = vst [vmem:[#allocation2_spill] sm:$0xff] %v3045_v7  ;;  %1071 = vmatpush.msra.mxu1 %v192_v4  ;;  %1129 = vmatpush.msra.mxu3 %v448_v5  ;;  %v304_v63 = vld [vmem:[%s4487_s1 + $0x860] sm:$0xff]  ;;  %v121_v56 = vld [vmem:[%s4487_s1 + $0x2a8] sm:$0xff]  ;;  %v203_v7 = vld [vmem:[%s4487_s1 + $0x538] sm:$0xff] }
  0xdb   :  { %1101 = vmatpush.msra.mxu2 %v312_v6  ;;  %1043 = vmatpush.msra.mxu0 %v56_v60  ;;  %4494 = vst [vmem:[#allocation3_spill] sm:$0xff] %v3059_v2  ;;  %v168_v11 = vld [vmem:[%s4487_s1 + $0x420] sm:$0xff]  ;;  %v249_v58 = vld [vmem:[%s4487_s1 + $0x6a8] sm:$0xff]  ;;  %v371_v2 = vld [vmem:[%s4487_s1 + $0xa78] sm:$0xff] }
  0xdc   :  { %1072 = vmatpush.msra.mxu1 %v184_v61  ;;  %1130 = vmatpush.msra.mxu3 %v440_v62  ;;  %v3067_v10 = vpop.f32.mrf.mxu0  ;;  %v424_v12 = vld [vmem:[%s4487_s1 + $0xc20] sm:$0xff]  ;;  %v3075_v13 = vpop.f32.mrf.mxu1  ;;  %v505_v59 = vld [vmem:[%s4487_s1 + $0xea8] sm:$0xff] }
  0xdd   :  { %4495 = vst [vmem:[#allocation4_spill] sm:$0xff] %v3067_v10  ;;  %1102 = vmatpush.msra.mxu2 %v304_v63  ;;  %1044 = vmatpush.msra.mxu0 %v48_v8  ;;  %v3086_v18 = vld [vmem:[%s4488_s0] sm:$0xff]  ;;  %v369_v5 = vld [vmem:[%s4487_s1 + $0xa68] sm:$0xff] }
  0xde   :  { %1073 = vmatpush.msra.mxu1 %v176_v0  ;;  %1131 = vmatpush.msra.mxu3 %v432_v1  ;;  %4496 = vst [vmem:[#allocation5_spill] sm:$0xff] %v3075_v13  ;;  %v3166_v43 = vld [vmem:[%s4488_s0 + $0x20] sm:$0xff]  ;;  %v113_v6 = vld [vmem:[%s4487_s1 + $0x268] sm:$0xff]  ;;  %v434_v13 = vld [vmem:[%s4487_s1 + $0xc70] sm:$0xff] }
  0xdf   :  { %1103 = vmatpush.msra.mxu2 %v296_v3  ;;  %1045 = vmatpush.msra.mxu0 %v40_v9  ;;  %v241_v60 = vld [vmem:[%s4487_s1 + $0x668] sm:$0xff] }
  0xe0   :  { %1074 = vmatpush.msra.mxu1 %v168_v11  ;;  %1132 = vmatpush.msra.mxu3 %v424_v12  ;;  %v497_v61 = vld [vmem:[%s4487_s1 + $0xe68] sm:$0xff] }
  0xe1   :  { %1046 = vmatmul.f32.vlgmr.msra.gmra.mxu0 %v3086_v18  ;;  %1075 = vmatmul.f32.vlgmr.msra.gmra.mxu1 %v3092_v19  ;;  %v361_v63 = vld [vmem:[%s4487_s1 + $0xa28] sm:$0xff] }
  0xe2   :  { %1104 = vmatmul.f32.vlgmr.msra.gmra.mxu2 %v3104_v26  ;;  %1133 = vmatmul.f32.vlgmr.msra.gmra.mxu3 %v3110_v20  ;;  %v105_v8 = vld [vmem:[%s4487_s1 + $0x228] sm:$0xff] }
  0xe3   :  { %1204 = vmatpush.msrb.mxu2 %v417_v15  ;;  %1146 = vmatpush.msrb.mxu0 %v161_v16  ;;  %v3125_v29 = vpop.f32.mrf.mxu2  ;;  %v3139_v36 = vpop.f32.mrf.mxu3  ;;  %v233_v1 = vld [vmem:[%s4487_s1 + $0x628] sm:$0xff]  ;;  %v3246_v15 = vld [vmem:[%s4488_s0 + $0x40] sm:$0xff] }
  0xe4   :  { %4497 = vst [vmem:[#allocation6_spill] sm:$0xff] %v3125_v29  ;;  %1175 = vmatpush.msrb.mxu1 %v289_v24  ;;  %1233 = vmatpush.msrb.mxu3 %v545_v25  ;;  %v489_v3 = vld [vmem:[%s4487_s1 + $0xe28] sm:$0xff] }
  0xe5   :  { %1205 = vmatpush.msrb.mxu2 %v409_v21  ;;  %1147 = vmatpush.msrb.mxu0 %v153_v22  ;;  %4498 = vst [vmem:[#allocation7_spill] sm:$0xff] %v3139_v36  ;;  %v353_v11 = vld [vmem:[%s4487_s1 + $0x9e8] sm:$0xff]  ;;  %v3264_v21 = vld [vmem:[%s4488_s0 + $0x50] sm:$0xff]  ;;  %v3270_v22 = vld [vmem:[%s4488_s0 + $0x58] sm:$0xff] }
  0xe6   :  { %1176 = vmatpush.msrb.mxu1 %v281_v23  ;;  %1234 = vmatpush.msrb.mxu3 %v537_v28  ;;  %v3147_v44 = vpop.f32.mrf.mxu0  ;;  %v3155_v40 = vpop.f32.mrf.mxu1  ;;  %v97_v12 = vld [vmem:[%s4487_s1 + $0x1e8] sm:$0xff]  ;;  %v466_v36 = vld [vmem:[%s4487_s1 + $0xd70] sm:$0xff] }
  0xe7   :  { %1206 = vmatpush.msrb.mxu2 %v401_v30  ;;  %1148 = vmatpush.msrb.mxu0 %v145_v32  ;;  %v3252_v16 = vld [vmem:[%s4488_s0 + $0x48] sm:$0xff] }
  0xe8   :  { %1177 = vmatpush.msrb.mxu1 %v273_v33  ;;  %1235 = vmatpush.msrb.mxu3 %v529_v35  ;;  %v225_v24 = vld [vmem:[%s4487_s1 + $0x5e8] sm:$0xff] }
  0xe9   :  { %1207 = vmatpush.msrb.mxu2 %v393_v38  ;;  %1149 = vmatpush.msrb.mxu0 %v137_v39  ;;  %v481_v25 = vld [vmem:[%s4487_s1 + $0xde8] sm:$0xff] }
  0xea   :  { %1178 = vmatpush.msrb.mxu1 %v265_v45  ;;  %1236 = vmatpush.msrb.mxu3 %v521_v46  ;;  %v345_v23 = vld [vmem:[%s4487_s1 + $0x9a8] sm:$0xff] }
  0xeb   :  { %1049 = vmatmul.f32.gmra.mxu0 %v3166_v43  ;;  %1078 = vmatmul.f32.gmra.mxu1 %v3172_v48  ;;  %v89_v28 = vld [vmem:[%s4487_s1 + $0x1a8] sm:$0xff] }
  0xec   :  { %1107 = vmatmul.f32.gmra.mxu2 %v3184_v52  ;;  %1136 = vmatmul.f32.gmra.mxu3 %v3190_v53  ;;  %v217_v30 = vld [vmem:[%s4487_s1 + $0x5a8] sm:$0xff] }
  0xed   :  { %1208 = vmatpush.msrb.mxu2 %v385_v41  ;;  %1150 = vmatpush.msrb.mxu0 %v129_v42  ;;  %v3205_v4 = vpop.f32.mrf.mxu2  ;;  %v3219_v62 = vpop.f32.mrf.mxu3  ;;  %v473_v32 = vld [vmem:[%s4487_s1 + $0xda8] sm:$0xff] }
  0xee   :  { %1179 = vmatpush.msrb.mxu1 %v257_v49  ;;  %1237 = vmatpush.msrb.mxu3 %v513_v50  ;;  %v337_v35 = vld [vmem:[%s4487_s1 + $0x968] sm:$0xff] }
  0xef   :  { %1209 = vmatpush.msrb.mxu2 %v377_v55  ;;  %1151 = vmatpush.msrb.mxu0 %v121_v56  ;;  %v81_v38 = vld [vmem:[%s4487_s1 + $0x168] sm:$0xff] }
  0xf0   :  { %1180 = vmatpush.msrb.mxu1 %v249_v58  ;;  %1238 = vmatpush.msrb.mxu3 %v505_v59  ;;  %v3227_v0 = vpop.f32.mrf.mxu0  ;;  %v3235_v9 = vpop.f32.mrf.mxu1  ;;  %v209_v39 = vld [vmem:[%s4487_s1 + $0x568] sm:$0xff] }
  0xf1   :  { %1210 = vmatpush.msrb.mxu2 %v369_v5  ;;  %1152 = vmatpush.msrb.mxu0 %v113_v6  ;;  %v465_v45 = vld [vmem:[%s4487_s1 + $0xd68] sm:$0xff]  ;;  %v3326_v5 = vld [vmem:[%s4488_s0 + $0x60] sm:$0xff] }
  0xf2   :  { %1181 = vmatpush.msrb.mxu1 %v241_v60  ;;  %1239 = vmatpush.msrb.mxu3 %v497_v61  ;;  %v329_v41 = vld [vmem:[%s4487_s1 + $0x928] sm:$0xff] }
  0xf3   :  { %1211 = vmatpush.msrb.mxu2 %v361_v63  ;;  %1153 = vmatpush.msrb.mxu0 %v105_v8  ;;  %v73_v42 = vld [vmem:[%s4487_s1 + $0x128] sm:$0xff]  ;;  %v3344_v63 = vld [vmem:[%s4488_s0 + $0x70] sm:$0xff]  ;;  %v3350_v8 = vld [vmem:[%s4488_s0 + $0x78] sm:$0xff] }
  0xf4   :  { %1182 = vmatpush.msrb.mxu1 %v233_v1  ;;  %1240 = vmatpush.msrb.mxu3 %v489_v3  ;;  %v201_v50 = vld [vmem:[%s4487_s1 + $0x528] sm:$0xff] }
  0xf5   :  { %1052 = vmatmul.f32.gmra.mxu0 %v3246_v15  ;;  %1081 = vmatmul.f32.gmra.mxu1 %v3252_v16  ;;  %v457_v55 = vld [vmem:[%s4487_s1 + $0xd28] sm:$0xff] }
  0xf6   :  { %1110 = vmatmul.f32.gmra.mxu2 %v3264_v21  ;;  %1139 = vmatmul.f32.gmra.mxu3 %v3270_v22  ;;  %v321_v58 = vld [vmem:[%s4487_s1 + $0x8e8] sm:$0xff] }
  0xf7   :  { %1212 = vmatpush.msrb.mxu2 %v353_v11  ;;  %1154 = vmatpush.msrb.mxu0 %v97_v12  ;;  %v3285_v33 = vpop.f32.mrf.mxu2  ;;  %v3299_v46 = vpop.f32.mrf.mxu3  ;;  %v65_v59 = vld [vmem:[%s4487_s1 + $0xe8] sm:$0xff] }
  0xf8   :  { %1183 = vmatpush.msrb.mxu1 %v225_v24  ;;  %1241 = vmatpush.msrb.mxu3 %v481_v25  ;;  %v3332_v6 = vld [vmem:[%s4488_s0 + $0x68] sm:$0xff] }
  0xf9   :  { %1213 = vmatpush.msrb.mxu2 %v345_v23  ;;  %1155 = vmatpush.msrb.mxu0 %v89_v28  ;;  %v193_v60 = vld [vmem:[%s4487_s1 + $0x4e8] sm:$0xff] }
  0xfa   :  { %1184 = vmatpush.msrb.mxu1 %v217_v30  ;;  %1242 = vmatpush.msrb.mxu3 %v473_v32  ;;  %v3307_v49 = vpop.f32.mrf.mxu0  ;;  %v3315_v56 = vpop.f32.mrf.mxu1  ;;  %v449_v61 = vld [vmem:[%s4487_s1 + $0xce8] sm:$0xff] }
  0xfb   :  { %1214 = vmatpush.msrb.mxu2 %v337_v35  ;;  %1156 = vmatpush.msrb.mxu0 %v81_v38  ;;  %v313_v1 = vld [vmem:[%s4487_s1 + $0x8a8] sm:$0xff] }
  0xfc   :  { %1185 = vmatpush.msrb.mxu1 %v209_v39  ;;  %1243 = vmatpush.msrb.mxu3 %v465_v45  ;;  %v57_v3 = vld [vmem:[%s4487_s1 + $0xa8] sm:$0xff] }
  0xfd   :  { %1215 = vmatpush.msrb.mxu2 %v329_v41  ;;  %1157 = vmatpush.msrb.mxu0 %v73_v42  ;;  %v185_v11 = vld [vmem:[%s4487_s1 + $0x4a8] sm:$0xff] }
  0xfe   :  { %1186 = vmatpush.msrb.mxu1 %v201_v50  ;;  %1244 = vmatpush.msrb.mxu3 %v457_v55  ;;  %v441_v12 = vld [vmem:[%s4487_s1 + $0xca8] sm:$0xff]  ;;  %v418_v50 = vld [vmem:[%s4487_s1 + $0xbf0] sm:$0xff] }
  0xff   :  { %1055 = vmatmul.f32.gmra.mxu0 %v3326_v5  ;;  %1084 = vmatmul.f32.gmra.mxu1 %v3332_v6  ;;  %v305_v25 = vld [vmem:[%s4487_s1 + $0x868] sm:$0xff]  ;;  %v162_v55 = vld [vmem:[%s4487_s1 + $0x3f0] sm:$0xff] }
 0x100   :  { %1113 = vmatmul.f32.gmra.mxu2 %v3344_v63  ;;  %1142 = vmatmul.f32.gmra.mxu3 %v3350_v8  ;;  %v49_v23 = vld [vmem:[%s4487_s1 + $0x68] sm:$0xff] }
 0x101   :  { %1216 = vmatpush.msrb.mxu2 %v321_v58  ;;  %1158 = vmatpush.msrb.mxu0 %v65_v59  ;;  %v3365_v24 = vpop.f32.mrf.mxu2  ;;  %v177_v28 = vld [vmem:[%s4487_s1 + $0x468] sm:$0xff]  ;;  %v3379_v32 = vpop.f32.mrf.mxu3  ;;  %v290_v58 = vld [vmem:[%s4487_s1 + $0x7f0] sm:$0xff] }
 0x102   :  { %4499 = vst [vmem:[#allocation8_spill] sm:$0xff] %v3365_v24  ;;  %1187 = vmatpush.msrb.mxu1 %v193_v60  ;;  %1245 = vmatpush.msrb.mxu3 %v449_v61  ;;  %v433_v30 = vld [vmem:[%s4487_s1 + $0xc68] sm:$0xff]  ;;  %v546_v59 = vld [vmem:[%s4487_s1 + $0xff0] sm:$0xff]  ;;  %v467_v24 = vld [vmem:[%s4487_s1 + $0xd78] sm:$0xff] }
 0x103   :  { %1217 = vmatpush.msrb.mxu2 %v313_v1  ;;  %1159 = vmatpush.msrb.mxu0 %v57_v3  ;;  %4500 = vst [vmem:[#allocation9_spill] sm:$0xff] %v3379_v32  ;;  %v297_v35 = vld [vmem:[%s4487_s1 + $0x828] sm:$0xff]  ;;  %v410_v60 = vld [vmem:[%s4487_s1 + $0xbb0] sm:$0xff]  ;;  %v267_v32 = vld [vmem:[%s4487_s1 + $0x738] sm:$0xff] }
 0x104   :  { %1188 = vmatpush.msrb.mxu1 %v185_v11  ;;  %1246 = vmatpush.msrb.mxu3 %v441_v12  ;;  %v41_v38 = vld [vmem:[%s4487_s1 + $0x28] sm:$0xff]  ;;  %v3387_v39 = vpop.f32.mrf.mxu0  ;;  %v3395_v42 = vpop.f32.mrf.mxu1  ;;  %v154_v61 = vld [vmem:[%s4487_s1 + $0x3b0] sm:$0xff] }
 0x105   :  { %4501 = vst [vmem:[#allocation10_spill] sm:$0xff] %v3387_v39  ;;  %1218 = vmatpush.msrb.mxu2 %v305_v25  ;;  %1160 = vmatpush.msrb.mxu0 %v49_v23  ;;  %v169_v45 = vld [vmem:[%s4487_s1 + $0x428] sm:$0xff]  ;;  %v282_v1 = vld [vmem:[%s4487_s1 + $0x7b0] sm:$0xff]  ;;  %v339_v39 = vld [vmem:[%s4487_s1 + $0x978] sm:$0xff] }
 0x106   :  { %v425_v41 = vld [vmem:[%s4487_s1 + $0xc28] sm:$0xff]  ;;  %1189 = vmatpush.msrb.mxu1 %v177_v28  ;;  %1247 = vmatpush.msrb.mxu3 %v433_v30  ;;  %4502 = vst [vmem:[#allocation11_spill] sm:$0xff] %v3395_v42  ;;  %v538_v3 = vld [vmem:[%s4487_s1 + $0xfb0] sm:$0xff] }
 0x107   :  { %1219 = vmatpush.msrb.mxu2 %v297_v35  ;;  %1161 = vmatpush.msrb.mxu0 %v41_v38  ;;  %v402_v12 = vld [vmem:[%s4487_s1 + $0xb70] sm:$0xff] }
 0x108   :  { %1190 = vmatpush.msrb.mxu1 %v169_v45  ;;  %1248 = vmatpush.msrb.mxu3 %v425_v41  ;;  %v146_v25 = vld [vmem:[%s4487_s1 + $0x370] sm:$0xff] }
 0x109   :  { %1162 = vmatmul.f32.vlgmr.msrb.gmra.mxu0 %v3086_v18  ;;  %1191 = vmatmul.f32.vlgmr.msrb.gmra.mxu1 %v3092_v19  ;;  %v274_v23 = vld [vmem:[%s4487_s1 + $0x770] sm:$0xff] }
 0x10a   :  { %1220 = vmatmul.f32.vlgmr.msrb.gmra.mxu2 %v3104_v26  ;;  %1249 = vmatmul.f32.vlgmr.msrb.gmra.mxu3 %v3110_v20  ;;  %v530_v28 = vld [vmem:[%s4487_s1 + $0xf70] sm:$0xff] }
 0x10b   :  { %1320 = vmatpush.msra.mxu2 %v418_v50  ;;  %1262 = vmatpush.msra.mxu0 %v162_v55  ;;  %v3425_v11 = vpop.f32.mrf.mxu2  ;;  %v3439_v30 = vpop.f32.mrf.mxu3  ;;  %v394_v35 = vld [vmem:[%s4487_s1 + $0xb30] sm:$0xff] }
 0x10c   :  { %4503 = vst [vmem:[#allocation12_spill] sm:$0xff] %v3425_v11  ;;  %1291 = vmatpush.msra.mxu1 %v290_v58  ;;  %1349 = vmatpush.msra.mxu3 %v546_v59  ;;  %v138_v38 = vld [vmem:[%s4487_s1 + $0x330] sm:$0xff] }
 0x10d   :  { %1321 = vmatpush.msra.mxu2 %v410_v60  ;;  %1263 = vmatpush.msra.mxu0 %v154_v61  ;;  %4504 = vst [vmem:[#allocation13_spill] sm:$0xff] %v3439_v30  ;;  %v266_v41 = vld [vmem:[%s4487_s1 + $0x730] sm:$0xff] }
 0x10e   :  { %1292 = vmatpush.msra.mxu1 %v282_v1  ;;  %1350 = vmatpush.msra.mxu3 %v538_v3  ;;  %v3447_v45 = vpop.f32.mrf.mxu0  ;;  %v522_v50 = vld [vmem:[%s4487_s1 + $0xf30] sm:$0xff]  ;;  %v3455_v55 = vpop.f32.mrf.mxu1 }
 0x10f   :  { %1322 = vmatpush.msra.mxu2 %v402_v12  ;;  %1264 = vmatpush.msra.mxu0 %v146_v25  ;;  %v386_v58 = vld [vmem:[%s4487_s1 + $0xaf0] sm:$0xff] }
 0x110   :  { %1293 = vmatpush.msra.mxu1 %v274_v23  ;;  %1351 = vmatpush.msra.mxu3 %v530_v28  ;;  %v130_v59 = vld [vmem:[%s4487_s1 + $0x2f0] sm:$0xff] }
 0x111   :  { %1323 = vmatpush.msra.mxu2 %v394_v35  ;;  %1265 = vmatpush.msra.mxu0 %v138_v38  ;;  %v258_v60 = vld [vmem:[%s4487_s1 + $0x6f0] sm:$0xff] }
 0x112   :  { %1294 = vmatpush.msra.mxu1 %v266_v41  ;;  %1352 = vmatpush.msra.mxu3 %v522_v50  ;;  %v514_v61 = vld [vmem:[%s4487_s1 + $0xef0] sm:$0xff] }
 0x113   :  { %1165 = vmatmul.f32.gmra.mxu0 %v3166_v43  ;;  %1194 = vmatmul.f32.gmra.mxu1 %v3172_v48  ;;  %v378_v1 = vld [vmem:[%s4487_s1 + $0xab0] sm:$0xff] }
 0x114   :  { %1223 = vmatmul.f32.gmra.mxu2 %v3184_v52  ;;  %1252 = vmatmul.f32.gmra.mxu3 %v3190_v53  ;;  %v122_v3 = vld [vmem:[%s4487_s1 + $0x2b0] sm:$0xff] }
 0x115   :  { %1324 = vmatpush.msra.mxu2 %v386_v58  ;;  %1266 = vmatpush.msra.mxu0 %v130_v59  ;;  %v250_v12 = vld [vmem:[%s4487_s1 + $0x6b0] sm:$0xff]  ;;  %v3485_v23 = vpop.f32.mrf.mxu2  ;;  %v3499_v50 = vpop.f32.mrf.mxu3 }
 0x116   :  { %v506_v25 = vld [vmem:[%s4487_s1 + $0xeb0] sm:$0xff]  ;;  %1295 = vmatpush.msra.mxu1 %v258_v60  ;;  %1353 = vmatpush.msra.mxu3 %v514_v61 }
 0x117   :  { %v370_v28 = vld [vmem:[%s4487_s1 + $0xa70] sm:$0xff]  ;;  %1325 = vmatpush.msra.mxu2 %v378_v1  ;;  %1267 = vmatpush.msra.mxu0 %v122_v3 }
 0x118   :  { %v114_v35 = vld [vmem:[%s4487_s1 + $0x270] sm:$0xff]  ;;  %1296 = vmatpush.msra.mxu1 %v250_v12  ;;  %1354 = vmatpush.msra.mxu3 %v506_v25  ;;  %v3507_v60 = vpop.f32.mrf.mxu0  ;;  %v3515_v3 = vpop.f32.mrf.mxu1 }
 0x119   :  { %v242_v38 = vld [vmem:[%s4487_s1 + $0x670] sm:$0xff]  ;;  %1326 = vmatpush.msra.mxu2 %v370_v28  ;;  %1268 = vmatpush.msra.mxu0 %v114_v35 }
 0x11a   :  { %v498_v41 = vld [vmem:[%s4487_s1 + $0xe70] sm:$0xff]  ;;  %1297 = vmatpush.msra.mxu1 %v242_v38 }
 0x11b   :  { %v362_v58 = vld [vmem:[%s4487_s1 + $0xa30] sm:$0xff]  ;;  %1355 = vmatpush.msra.mxu3 %v498_v41  ;;  %1168 = vmatmul.f32.gmra.mxu0 %v3246_v15 }
 0x11c   :  { %v106_v59 = vld [vmem:[%s4487_s1 + $0x230] sm:$0xff]  ;;  %1327 = vmatpush.msra.mxu2 %v362_v58  ;;  %1197 = vmatmul.f32.gmra.mxu1 %v3252_v16 }
 0x11d   :  { %v234_v61 = vld [vmem:[%s4487_s1 + $0x630] sm:$0xff]  ;;  %1269 = vmatpush.msra.mxu0 %v106_v59  ;;  %1226 = vmatmul.f32.gmra.mxu2 %v3264_v21 }
 0x11e   :  { %v490_v1 = vld [vmem:[%s4487_s1 + $0xe30] sm:$0xff]  ;;  %1298 = vmatpush.msra.mxu1 %v234_v61  ;;  %1255 = vmatmul.f32.gmra.mxu3 %v3270_v22 }
 0x11f   :  { %1356 = vmatpush.msra.mxu3 %v490_v1  ;;  %v354_v12 = vld [vmem:[%s4487_s1 + $0x9f0] sm:$0xff]  ;;  %v3545_v61 = vpop.f32.mrf.mxu2 }
 0x120   :  { %v98_v25 = vld [vmem:[%s4487_s1 + $0x1f0] sm:$0xff]  ;;  %1328 = vmatpush.msra.mxu2 %v354_v12 }
 0x121   :  { %v226_v28 = vld [vmem:[%s4487_s1 + $0x5f0] sm:$0xff]  ;;  %1270 = vmatpush.msra.mxu0 %v98_v25 }
 0x122   :  { %v482_v35 = vld [vmem:[%s4487_s1 + $0xdf0] sm:$0xff]  ;;  %1299 = vmatpush.msra.mxu1 %v226_v28  ;;  %v3559_v28 = vpop.f32.mrf.mxu3 }
 0x123   :  { %v346_v38 = vld [vmem:[%s4487_s1 + $0x9b0] sm:$0xff]  ;;  %1357 = vmatpush.msra.mxu3 %v482_v35  ;;  %1171 = vmatmul.f32.gmra.mxu0 %v3326_v5 }
 0x124   :  { %v90_v41 = vld [vmem:[%s4487_s1 + $0x1b0] sm:$0xff]  ;;  %1329 = vmatpush.msra.mxu2 %v346_v38  ;;  %1200 = vmatmul.f32.gmra.mxu1 %v3332_v6 }
 0x125   :  { %v218_v58 = vld [vmem:[%s4487_s1 + $0x5b0] sm:$0xff]  ;;  %1271 = vmatpush.msra.mxu0 %v90_v41  ;;  %v3567_v41 = vpop.f32.mrf.mxu0  ;;  %1229 = vmatmul.f32.gmra.mxu2 %v3344_v63 }
 0x126   :  { %v474_v59 = vld [vmem:[%s4487_s1 + $0xdb0] sm:$0xff]  ;;  %1300 = vmatpush.msra.mxu1 %v218_v58  ;;  %1258 = vmatmul.f32.gmra.mxu3 %v3350_v8 }
 0x127   :  { %v338_v1 = vld [vmem:[%s4487_s1 + $0x970] sm:$0xff]  ;;  %1358 = vmatpush.msra.mxu3 %v474_v59  ;;  %v3575_v59 = vpop.f32.mrf.mxu1 }
 0x128   :  { %v82_v12 = vld [vmem:[%s4487_s1 + $0x170] sm:$0xff]  ;;  %1330 = vmatpush.msra.mxu2 %v338_v1  ;;  %4505 = vst [vmem:[#allocation14_spill] sm:$0xff] %v3575_v59  ;;  %v171_v59 = vld [vmem:[%s4487_s1 + $0x438] sm:$0xff] }
 0x129   :  { %v210_v25 = vld [vmem:[%s4487_s1 + $0x570] sm:$0xff]  ;;  %1272 = vmatpush.msra.mxu0 %v82_v12  ;;  %1359 = vmatpush.msra.mxu3 %v466_v36  ;;  %v3605_v29 = vpop.f32.mrf.mxu2 }
 0x12a   :  { %v330_v35 = vld [vmem:[%s4487_s1 + $0x930] sm:$0xff]  ;;  %1301 = vmatpush.msra.mxu1 %v210_v25  ;;  %4506 = vst [vmem:[#allocation15_spill] sm:$0xff] %v3605_v29  ;;  %v235_v29 = vld [vmem:[%s4487_s1 + $0x638] sm:$0xff] }
 0x12b   :  { %v74_v38 = vld [vmem:[%s4487_s1 + $0x130] sm:$0xff]  ;;  %1331 = vmatpush.msra.mxu2 %v330_v35 }
 0x12c   :  { %v202_v30 = vld [vmem:[%s4487_s1 + $0x530] sm:$0xff]  ;;  %1273 = vmatpush.msra.mxu0 %v74_v38 }
 0x12d   :  { %v458_v58 = vld [vmem:[%s4487_s1 + $0xd30] sm:$0xff]  ;;  %1302 = vmatpush.msra.mxu1 %v202_v30 }
 0x12e   :  { %1360 = vmatpush.msra.mxu3 %v458_v58  ;;  %v322_v1 = vld [vmem:[%s4487_s1 + $0x8f0] sm:$0xff] }
 0x12f   :  { %v66_v12 = vld [vmem:[%s4487_s1 + $0xf0] sm:$0xff]  ;;  %1332 = vmatpush.msra.mxu2 %v322_v1 }
 0x130   :  { %v194_v36 = vld [vmem:[%s4487_s1 + $0x4f0] sm:$0xff]  ;;  %1274 = vmatpush.msra.mxu0 %v66_v12 }
 0x131   :  { %v450_v30 = vld [vmem:[%s4487_s1 + $0xcf0] sm:$0xff]  ;;  %1303 = vmatpush.msra.mxu1 %v194_v36  ;;  %v3619_v36 = vpop.f32.mrf.mxu3 }
 0x132   :  { %v314_v25 = vld [vmem:[%s4487_s1 + $0x8b0] sm:$0xff]  ;;  %1361 = vmatpush.msra.mxu3 %v450_v30  ;;  %4507 = vst [vmem:[#allocation16_spill] sm:$0xff] %v3619_v36  ;;  %v403_v36 = vld [vmem:[%s4487_s1 + $0xb78] sm:$0xff] }
 0x133   :  { %v58_v35 = vld [vmem:[%s4487_s1 + $0xb0] sm:$0xff]  ;;  %1333 = vmatpush.msra.mxu2 %v314_v25 }
 0x134   :  { %v186_v38 = vld [vmem:[%s4487_s1 + $0x4b0] sm:$0xff]  ;;  %1275 = vmatpush.msra.mxu0 %v58_v35  ;;  %v3627_v35 = vpop.f32.mrf.mxu0 }
 0x135   :  { %v442_v58 = vld [vmem:[%s4487_s1 + $0xcb0] sm:$0xff]  ;;  %1304 = vmatpush.msra.mxu1 %v186_v38  ;;  %4508 = vst [vmem:[#allocation17_spill] sm:$0xff] %v3627_v35  ;;  %v499_v35 = vld [vmem:[%s4487_s1 + $0xe78] sm:$0xff] }
 0x136   :  { %v306_v11 = vld [vmem:[%s4487_s1 + $0x870] sm:$0xff]  ;;  %1362 = vmatpush.msra.mxu3 %v442_v58  ;;  %v3635_v58 = vpop.f32.mrf.mxu1 }
 0x137   :  { %v50_v1 = vld [vmem:[%s4487_s1 + $0x70] sm:$0xff]  ;;  %1334 = vmatpush.msra.mxu2 %v306_v11  ;;  %4509 = vst [vmem:[#allocation18_spill] sm:$0xff] %v3635_v58  ;;  %v419_v11 = vld [vmem:[%s4487_s1 + $0xbf8] sm:$0xff]  ;;  %v3665_v58 = vpop.f32.mrf.mxu2 }
 0x138   :  { %v178_v12 = vld [vmem:[%s4487_s1 + $0x470] sm:$0xff]  ;;  %1276 = vmatpush.msra.mxu0 %v50_v1  ;;  %1363 = vmatpush.msra.mxu3 %v434_v13  ;;  %v163_v1 = vld [vmem:[%s4487_s1 + $0x3f8] sm:$0xff]  ;;  %4510 = vst [vmem:[#allocation19_spill] sm:$0xff] %v3665_v58 }
 0x139   :  { %v298_v30 = vld [vmem:[%s4487_s1 + $0x830] sm:$0xff]  ;;  %1305 = vmatpush.msra.mxu1 %v178_v12  ;;  %v291_v13 = vld [vmem:[%s4487_s1 + $0x7f8] sm:$0xff] }
 0x13a   :  { %v42_v25 = vld [vmem:[%s4487_s1 + $0x30] sm:$0xff]  ;;  %1335 = vmatpush.msra.mxu2 %v298_v30  ;;  %v411_v12 = vld [vmem:[%s4487_s1 + $0xbb8] sm:$0xff] }
 0x13b   :  { %v170_v42 = vld [vmem:[%s4487_s1 + $0x430] sm:$0xff]  ;;  %1277 = vmatpush.msra.mxu0 %v42_v25  ;;  %1336 = vmatmul.f32.vlgmr.msra.gmra.mxu2 %v3104_v26  ;;  %v155_v30 = vld [vmem:[%s4487_s1 + $0x3b8] sm:$0xff] }
 0x13c   :  { %v426_v38 = vld [vmem:[%s4487_s1 + $0xc30] sm:$0xff]  ;;  %1306 = vmatpush.msra.mxu1 %v170_v42  ;;  %1278 = vmatmul.f32.vlgmr.msra.gmra.mxu0 %v3086_v18  ;;  %v547_v42 = vld [vmem:[%s4487_s1 + $0xff8] sm:$0xff] }
 0x13d   :  { %1364 = vmatpush.msra.mxu3 %v426_v38  ;;  %1307 = vmatmul.f32.vlgmr.msra.gmra.mxu1 %v3092_v19  ;;  %v283_v25 = vld [vmem:[%s4487_s1 + $0x7b8] sm:$0xff] }
 0x13e   :  { %1365 = vmatmul.f32.vlgmr.msra.gmra.mxu3 %v3110_v20  ;;  %1436 = vmatpush.msrb.mxu2 %v419_v11  ;;  %v539_v38 = vld [vmem:[%s4487_s1 + $0xfb8] sm:$0xff] }
 0x13f   :  { %1378 = vmatpush.msrb.mxu0 %v163_v1  ;;  %1407 = vmatpush.msrb.mxu1 %v291_v13  ;;  %v147_v11 = vld [vmem:[%s4487_s1 + $0x378] sm:$0xff]  ;;  %v3679_v13 = vpop.f32.mrf.mxu3 }
 0x140   :  { %1465 = vmatpush.msrb.mxu3 %v547_v42  ;;  %1437 = vmatpush.msrb.mxu2 %v411_v12  ;;  %v275_v1 = vld [vmem:[%s4487_s1 + $0x778] sm:$0xff]  ;;  %4511 = vst [vmem:[#allocation20_spill] sm:$0xff] %v3679_v13  ;;  %v3725_v13 = vpop.f32.mrf.mxu2 }
 0x141   :  { %1379 = vmatpush.msrb.mxu0 %v155_v30  ;;  %v531_v58 = vld [vmem:[%s4487_s1 + $0xf78] sm:$0xff]  ;;  %1408 = vmatpush.msrb.mxu1 %v283_v25  ;;  %v3687_v30 = vpop.f32.mrf.mxu0 }
 0x142   :  { %1466 = vmatpush.msrb.mxu3 %v539_v38  ;;  %v395_v42 = vld [vmem:[%s4487_s1 + $0xb38] sm:$0xff]  ;;  %1438 = vmatpush.msrb.mxu2 %v403_v36  ;;  %v3695_v38 = vpop.f32.mrf.mxu1 }
 0x143   :  { %v139_v12 = vld [vmem:[%s4487_s1 + $0x338] sm:$0xff]  ;;  %1380 = vmatpush.msrb.mxu0 %v147_v11  ;;  %1409 = vmatpush.msrb.mxu1 %v275_v1 }
 0x144   :  { %v523_v25 = vld [vmem:[%s4487_s1 + $0xf38] sm:$0xff]  ;;  %1467 = vmatpush.msrb.mxu3 %v531_v58  ;;  %1439 = vmatpush.msrb.mxu2 %v395_v42 }
 0x145   :  { %1381 = vmatpush.msrb.mxu0 %v139_v12  ;;  %1410 = vmatpush.msrb.mxu1 %v267_v32  ;;  %v387_v36 = vld [vmem:[%s4487_s1 + $0xaf8] sm:$0xff] }
 0x146   :  { %1468 = vmatpush.msrb.mxu3 %v523_v25  ;;  %v131_v11 = vld [vmem:[%s4487_s1 + $0x2f8] sm:$0xff]  ;;  %1281 = vmatmul.f32.gmra.mxu0 %v3166_v43 }
 0x147   :  { %1310 = vmatmul.f32.gmra.mxu1 %v3172_v48  ;;  %v259_v58 = vld [vmem:[%s4487_s1 + $0x6f8] sm:$0xff]  ;;  %1339 = vmatmul.f32.gmra.mxu2 %v3184_v52 }
 0x148   :  { %v515_v32 = vld [vmem:[%s4487_s1 + $0xef8] sm:$0xff]  ;;  %1368 = vmatmul.f32.gmra.mxu3 %v3190_v53  ;;  %1440 = vmatpush.msrb.mxu2 %v387_v36  ;;  %v3785_v10 = vpop.f32.mrf.mxu2 }
 0x149   :  { %v379_v1 = vld [vmem:[%s4487_s1 + $0xab8] sm:$0xff]  ;;  %1382 = vmatpush.msrb.mxu0 %v131_v11  ;;  %1411 = vmatpush.msrb.mxu1 %v259_v58  ;;  %v3739_v58 = vpop.f32.mrf.mxu3 }
 0x14a   :  { %v123_v42 = vld [vmem:[%s4487_s1 + $0x2b8] sm:$0xff]  ;;  %1469 = vmatpush.msrb.mxu3 %v515_v32  ;;  %1441 = vmatpush.msrb.mxu2 %v379_v1 }
 0x14b   :  { %v251_v12 = vld [vmem:[%s4487_s1 + $0x6b8] sm:$0xff]  ;;  %1383 = vmatpush.msrb.mxu0 %v123_v42  ;;  %v3747_v42 = vpop.f32.mrf.mxu0 }
 0x14c   :  { %v507_v25 = vld [vmem:[%s4487_s1 + $0xeb8] sm:$0xff]  ;;  %1412 = vmatpush.msrb.mxu1 %v251_v12  ;;  %1442 = vmatpush.msrb.mxu2 %v371_v2 }
 0x14d   :  { %v115_v36 = vld [vmem:[%s4487_s1 + $0x278] sm:$0xff]  ;;  %1470 = vmatpush.msrb.mxu3 %v507_v25  ;;  %v3755_v25 = vpop.f32.mrf.mxu1 }
 0x14e   :  { %v243_v11 = vld [vmem:[%s4487_s1 + $0x678] sm:$0xff]  ;;  %1384 = vmatpush.msrb.mxu0 %v115_v36 }
 0x14f   :  { %v363_v32 = vld [vmem:[%s4487_s1 + $0xa38] sm:$0xff]  ;;  %1413 = vmatpush.msrb.mxu1 %v243_v11  ;;  %1471 = vmatpush.msrb.mxu3 %v499_v35 }
 0x150   :  { %v107_v1 = vld [vmem:[%s4487_s1 + $0x238] sm:$0xff]  ;;  %1443 = vmatpush.msrb.mxu2 %v363_v32  ;;  %1284 = vmatmul.f32.gmra.mxu0 %v3246_v15 }
 0x151   :  { %v491_v12 = vld [vmem:[%s4487_s1 + $0xe38] sm:$0xff]  ;;  %1385 = vmatpush.msrb.mxu0 %v107_v1  ;;  %1414 = vmatpush.msrb.mxu1 %v235_v29 }
 0x152   :  { %1472 = vmatpush.msrb.mxu3 %v491_v12  ;;  %v355_v2 = vld [vmem:[%s4487_s1 + $0x9f8] sm:$0xff]  ;;  %1313 = vmatmul.f32.gmra.mxu1 %v3252_v16 }
 0x153   :  { %v99_v36 = vld [vmem:[%s4487_s1 + $0x1f8] sm:$0xff]  ;;  %1342 = vmatmul.f32.gmra.mxu2 %v3264_v21  ;;  %1371 = vmatmul.f32.gmra.mxu3 %v3270_v22 }
 0x154   :  { %v227_v35 = vld [vmem:[%s4487_s1 + $0x5f8] sm:$0xff]  ;;  %1444 = vmatpush.msrb.mxu2 %v355_v2  ;;  %1386 = vmatpush.msrb.mxu0 %v99_v36 }
 0x155   :  { %v483_v29 = vld [vmem:[%s4487_s1 + $0xdf8] sm:$0xff]  ;;  %1415 = vmatpush.msrb.mxu1 %v227_v35  ;;  %v3799_v35 = vpop.f32.mrf.mxu3 }
 0x156   :  { %v347_v11 = vld [vmem:[%s4487_s1 + $0x9b8] sm:$0xff]  ;;  %1473 = vmatpush.msrb.mxu3 %v483_v29  ;;  %4512 = vst [vmem:[#allocation21_spill] sm:$0xff] %v3799_v35 }
 0x157   :  { %v91_v32 = vld [vmem:[%s4487_s1 + $0x1b8] sm:$0xff]  ;;  %1445 = vmatpush.msrb.mxu2 %v347_v11 }
 0x158   :  { %v219_v1 = vld [vmem:[%s4487_s1 + $0x5b8] sm:$0xff]  ;;  %1387 = vmatpush.msrb.mxu0 %v91_v32  ;;  %v3807_v32 = vpop.f32.mrf.mxu0 }
 0x159   :  { %v475_v12 = vld [vmem:[%s4487_s1 + $0xdb8] sm:$0xff]  ;;  %1416 = vmatpush.msrb.mxu1 %v219_v1  ;;  %1446 = vmatpush.msrb.mxu2 %v339_v39 }
 0x15a   :  { %v83_v2 = vld [vmem:[%s4487_s1 + $0x178] sm:$0xff]  ;;  %1474 = vmatpush.msrb.mxu3 %v475_v12  ;;  %v3815_v12 = vpop.f32.mrf.mxu1  ;;  %1287 = vmatmul.f32.gmra.mxu0 %v3326_v5 }
 0x15b   :  { %v211_v36 = vld [vmem:[%s4487_s1 + $0x578] sm:$0xff]  ;;  %1388 = vmatpush.msrb.mxu0 %v83_v2  ;;  %4513 = vst [vmem:[#allocation22_spill] sm:$0xff] %v3815_v12  ;;  %1316 = vmatmul.f32.gmra.mxu1 %v3332_v6  ;;  %v3845_v12 = vpop.f32.mrf.mxu2 }
 0x15c   :  { %v331_v29 = vld [vmem:[%s4487_s1 + $0x938] sm:$0xff]  ;;  %1417 = vmatpush.msrb.mxu1 %v211_v36  ;;  %1475 = vmatpush.msrb.mxu3 %v467_v24  ;;  %4514 = vst [vmem:[#allocation23_spill] sm:$0xff] %v3845_v12 }
 0x15d   :  { %v75_v11 = vld [vmem:[%s4487_s1 + $0x138] sm:$0xff]  ;;  %1447 = vmatpush.msrb.mxu2 %v331_v29  ;;  %1374 = vmatmul.f32.gmra.mxu3 %v3350_v8 }
 0x15e   :  { %v459_v1 = vld [vmem:[%s4487_s1 + $0xd38] sm:$0xff]  ;;  %1389 = vmatpush.msrb.mxu0 %v75_v11  ;;  %1418 = vmatpush.msrb.mxu1 %v203_v7 }
 0x15f   :  { %1476 = vmatpush.msrb.mxu3 %v459_v1  ;;  %v323_v39 = vld [vmem:[%s4487_s1 + $0x8f8] sm:$0xff]  ;;  %1345 = vmatmul.f32.gmra.mxu2 %v3344_v63 }
 0x160   :  { %v67_v2 = vld [vmem:[%s4487_s1 + $0xf8] sm:$0xff]  ;;  %1448 = vmatpush.msrb.mxu2 %v323_v39 }
 0x161   :  { %v195_v24 = vld [vmem:[%s4487_s1 + $0x4f8] sm:$0xff]  ;;  %1390 = vmatpush.msrb.mxu0 %v67_v2 }
 0x162   :  { %v451_v7 = vld [vmem:[%s4487_s1 + $0xcf8] sm:$0xff]  ;;  %1419 = vmatpush.msrb.mxu1 %v195_v24  ;;  %v3859_v24 = vpop.f32.mrf.mxu3 }
 0x163   :  { %v315_v36 = vld [vmem:[%s4487_s1 + $0x8b8] sm:$0xff]  ;;  %1477 = vmatpush.msrb.mxu3 %v451_v7 }
 0x164   :  { %v59_v29 = vld [vmem:[%s4487_s1 + $0xb8] sm:$0xff]  ;;  %1449 = vmatpush.msrb.mxu2 %v315_v36 }
 0x165   :  { %v187_v11 = vld [vmem:[%s4487_s1 + $0x4b8] sm:$0xff]  ;;  %1391 = vmatpush.msrb.mxu0 %v59_v29  ;;  %v3867_v29 = vpop.f32.mrf.mxu0 }
 0x166   :  { %v443_v1 = vld [vmem:[%s4487_s1 + $0xcb8] sm:$0xff]  ;;  %1420 = vmatpush.msrb.mxu1 %v187_v11 }
 0x167   :  { %v307_v35 = vld [vmem:[%s4487_s1 + $0x878] sm:$0xff]  ;;  %1478 = vmatpush.msrb.mxu3 %v443_v1  ;;  %v3875_v1 = vpop.f32.mrf.mxu1 }
 0x168   :  { %v51_v39 = vld [vmem:[%s4487_s1 + $0x78] sm:$0xff]  ;;  %1450 = vmatpush.msrb.mxu2 %v307_v35 }
 0x169   :  { %v179_v2 = vld [vmem:[%s4487_s1 + $0x478] sm:$0xff]  ;;  %1392 = vmatpush.msrb.mxu0 %v51_v39 }
 0x16a   :  { %v435_v12 = vld [vmem:[%s4487_s1 + $0xc78] sm:$0xff]  ;;  %1421 = vmatpush.msrb.mxu1 %v179_v2  ;;  %v1540_v2 = vld [vmem:[%s4489_s3 + $0x70] sm:$0xff] }
 0x16b   :  { %v299_v7 = vld [vmem:[%s4487_s1 + $0x838] sm:$0xff]  ;;  %1479 = vmatpush.msrb.mxu3 %v435_v12 }
 0x16c   :  { %v43_v36 = vld [vmem:[%s4487_s1 + $0x38] sm:$0xff]  ;;  %1451 = vmatpush.msrb.mxu2 %v299_v7  ;;  %1422 = vmatpush.msrb.mxu1 %v171_v59  ;;  %v3905_v7 = vpop.f32.mrf.mxu2 }
 0x16d   :  { %v427_v11 = vld [vmem:[%s4487_s1 + $0xc38] sm:$0xff]  ;;  %1393 = vmatpush.msrb.mxu0 %v43_v36  ;;  %1423 = vmatmul.f32.vlgmr.msrb.gmra.mxu1 %v3092_v19  ;;  %v1572_v19 = vld [vmem:[%s4489_s3 + $0x170] sm:$0xff]  ;;  %v1555_v36 = vld [vmem:[%s4489_s3 + $0xe8] sm:$0xff] }
 0x16e   :  { %1480 = vmatpush.msrb.mxu3 %v427_v11  ;;  %v1541_v35 = vld [vmem:[%s4489_s3 + $0x78] sm:$0xff]  ;;  %1394 = vmatmul.f32.vlgmr.msrb.gmra.mxu0 %v3086_v18  ;;  %v1556_v18 = vld [vmem:[%s4489_s3 + $0xf0] sm:$0xff]  ;;  %v1571_v11 = vld [vmem:[%s4489_s3 + $0x168] sm:$0xff] }
 0x16f   :  { %v1557_v39 = vld [vmem:[%s4489_s3 + $0xf8] sm:$0xff]  ;;  %1452 = vmatmul.f32.vlgmr.msrb.gmra.mxu2 %v3104_v26  ;;  %1481 = vmatmul.f32.vlgmr.msrb.gmra.mxu3 %v3110_v20  ;;  %v1588_v26 = vld [vmem:[%s4489_s3 + $0x1f0] sm:$0xff]  ;;  %v1539_v20 = vld [vmem:[%s4489_s3 + $0x68] sm:$0xff] }
 0x170   :  { %v1573_v12 = vld [vmem:[%s4489_s3 + $0x178] sm:$0xff]  ;;  %1658 = vmatpush.msra.mxu0 %v1541_v35  ;;  %1687 = vmatpush.msra.mxu1 %v1557_v39  ;;  %v1587_v35 = vld [vmem:[%s4489_s3 + $0x1e8] sm:$0xff]  ;;  %v3919_v39 = vpop.f32.mrf.mxu3 }
 0x171   :  { %v1589_v59 = vld [vmem:[%s4489_s3 + $0x1f8] sm:$0xff]  ;;  %1716 = vmatpush.msra.mxu2 %v1573_v12  ;;  %4515 = vst [vmem:[#allocation24_spill] sm:$0xff] %v3919_v39  ;;  %v1538_v12 = vld [vmem:[%s4489_s3 + $0x60] sm:$0xff] }
 0x172   :  { %1745 = vmatpush.msra.mxu3 %v1589_v59  ;;  %1659 = vmatpush.msra.mxu0 %v1540_v2  ;;  %v1554_v59 = vld [vmem:[%s4489_s3 + $0xe0] sm:$0xff]  ;;  %v3927_v2 = vpop.f32.mrf.mxu0 }
 0x173   :  { %1688 = vmatpush.msra.mxu1 %v1556_v18  ;;  %1717 = vmatpush.msra.mxu2 %v1572_v19  ;;  %v1570_v18 = vld [vmem:[%s4489_s3 + $0x160] sm:$0xff] }
 0x174   :  { %1746 = vmatpush.msra.mxu3 %v1588_v26  ;;  %1660 = vmatpush.msra.mxu0 %v1539_v20  ;;  %v1586_v19 = vld [vmem:[%s4489_s3 + $0x1e0] sm:$0xff]  ;;  %v3935_v26 = vpop.f32.mrf.mxu1  ;;  %v1537_v20 = vld [vmem:[%s4489_s3 + $0x58] sm:$0xff] }
 0x175   :  { %1689 = vmatpush.msra.mxu1 %v1555_v36  ;;  %1718 = vmatpush.msra.mxu2 %v1571_v11  ;;  %v1553_v36 = vld [vmem:[%s4489_s3 + $0xd8] sm:$0xff] }
 0x176   :  { %1747 = vmatpush.msra.mxu3 %v1587_v35  ;;  %1661 = vmatpush.msra.mxu0 %v1538_v12  ;;  %v1569_v11 = vld [vmem:[%s4489_s3 + $0x158] sm:$0xff]  ;;  %v1536_v12 = vld [vmem:[%s4489_s3 + $0x50] sm:$0xff] }
 0x177   :  { %1690 = vmatpush.msra.mxu1 %v1554_v59  ;;  %1719 = vmatpush.msra.mxu2 %v1570_v18  ;;  %v1585_v35 = vld [vmem:[%s4489_s3 + $0x1d8] sm:$0xff]  ;;  %v3965_v59 = vpop.f32.mrf.mxu2  ;;  %v1551_v18 = vld [vmem:[%s4489_s3 + $0xc8] sm:$0xff] }
 0x178   :  { %1748 = vmatpush.msra.mxu3 %v1586_v19  ;;  %1397 = vmatmul.f32.gmra.mxu0 %v3166_v43  ;;  %v1552_v43 = vld [vmem:[%s4489_s3 + $0xd0] sm:$0xff]  ;;  %4516 = vst [vmem:[#allocation25_spill] sm:$0xff] %v3965_v59  ;;  %v3976_v19 = vld [vmem:[%s4490_s2] sm:$0xff] }
 0x179   :  { %1426 = vmatmul.f32.gmra.mxu1 %v3172_v48  ;;  %1455 = vmatmul.f32.gmra.mxu2 %v3184_v52  ;;  %v1568_v48 = vld [vmem:[%s4489_s3 + $0x150] sm:$0xff]  ;;  %v1566_v59 = vld [vmem:[%s4489_s3 + $0x140] sm:$0xff] }
 0x17a   :  { %1484 = vmatmul.f32.gmra.mxu3 %v3190_v53  ;;  %1662 = vmatpush.msra.mxu0 %v1537_v20  ;;  %v1584_v52 = vld [vmem:[%s4489_s3 + $0x1d0] sm:$0xff]  ;;  %v1535_v53 = vld [vmem:[%s4489_s3 + $0x48] sm:$0xff] }
 0x17b   :  { %1691 = vmatpush.msra.mxu1 %v1553_v36  ;;  %1720 = vmatpush.msra.mxu2 %v1569_v11  ;;  %v1567_v20 = vld [vmem:[%s4489_s3 + $0x148] sm:$0xff]  ;;  %v3984_v11 = vpop.f32.mrf.mxu3 }
 0x17c   :  { %1749 = vmatpush.msra.mxu3 %v1585_v35  ;;  %1663 = vmatpush.msra.mxu0 %v1536_v12  ;;  %v1583_v36 = vld [vmem:[%s4489_s3 + $0x1c8] sm:$0xff]  ;;  %4517 = vst [vmem:[#allocation26_spill] sm:$0xff] %v3984_v11  ;;  %v1534_v35 = vld [vmem:[%s4489_s3 + $0x40] sm:$0xff]  ;;  %v4004_v11 = vperm.slane %v3976_v19, 1 }
 0x17d   :  { %1692 = vmatpush.msra.mxu1 %v1552_v43  ;;  %1721 = vmatpush.msra.mxu2 %v1568_v48  ;;  %v1550_v12 = vld [vmem:[%s4489_s3 + $0xc0] sm:$0xff]  ;;  %v3992_v43 = vpop.f32.mrf.mxu0 }
 0x17e   :  { %1750 = vmatpush.msra.mxu3 %v1584_v52  ;;  %4518 = vst [vmem:[#allocation27_spill] sm:$0xff] %v3992_v43  ;;  %1664 = vmatpush.msra.mxu0 %v1535_v53  ;;  %v1582_v48 = vld [vmem:[%s4489_s3 + $0x1c0] sm:$0xff]  ;;  %v4001_v52 = vperm.slane %v3976_v19, 0  ;;  %v4006_v53 = vpop.f32.mrf.mxu1  ;;  %v4012_v43 = vperm.slane %v3976_v19, 3 }
 0x17f   :  { %1693 = vmatpush.msra.mxu1 %v1551_v18  ;;  %1722 = vmatpush.msra.mxu2 %v1567_v20  ;;  %4519 = vst [vmem:[#allocation28_spill] sm:$0xff] %v4006_v53  ;;  %v4009_v18 = vperm.slane %v3976_v19, 2  ;;  %v1533_v20 = vld [vmem:[%s4489_s3 + $0x38] sm:$0xff] }
 0x180   :  { %1751 = vmatpush.msra.mxu3 %v1583_v36  ;;  %1665 = vmatpush.msra.mxu0 %v1534_v35  ;;  %v1549_v36 = vld [vmem:[%s4489_s3 + $0xb8] sm:$0xff]  ;;  %v932_v39 = vadd.f32 %v3687_v30, %v4012_v43 }
 0x181   :  { %1694 = vmatpush.msra.mxu1 %v1550_v12  ;;  %1723 = vmatpush.msra.mxu2 %v1566_v59  ;;  %v1565_v35 = vld [vmem:[%s4489_s3 + $0x138] sm:$0xff]  ;;  %v584_v12 = vadd.f32 %v2887_v14, %v4001_v52  ;;  %v1564_v14 = vld [vmem:[%s4489_s3 + $0x130] sm:$0xff]  ;;  %v816_v53 = vadd.f32 %v3447_v45, %v4009_v18  ;;  %v1579_v45 = vld [vmem:[%s4489_s3 + $0x1a8] sm:$0xff] }
 0x182   :  { %1752 = vmatpush.msra.mxu3 %v1582_v48  ;;  %1400 = vmatmul.f32.gmra.mxu0 %v3246_v15  ;;  %v1581_v59 = vld [vmem:[%s4489_s3 + $0x1b8] sm:$0xff]  ;;  %v1532_v15 = vld [vmem:[%s4489_s3 + $0x30] sm:$0xff]  ;;  %v700_v48 = vadd.f32 %v3147_v44, %v4004_v11  ;;  %v1531_v44 = vld [vmem:[%s4489_s3 + $0x28] sm:$0xff] }
 0x183   :  { %1429 = vmatmul.f32.gmra.mxu1 %v3252_v16  ;;  %1458 = vmatmul.f32.gmra.mxu2 %v3264_v21  ;;  %v1548_v16 = vld [vmem:[%s4489_s3 + $0xb0] sm:$0xff]  ;;  %v4064_v30 = vpop.f32.mrf.mxu3 }
 0x184   :  { %1487 = vmatmul.f32.gmra.mxu3 %v3270_v22  ;;  %1666 = vmatpush.msra.mxu0 %v1533_v20  ;;  %v1580_v21 = vld [vmem:[%s4489_s3 + $0x1b0] sm:$0xff]  ;;  %v4046_v22 = vpop.f32.mrf.mxu2  ;;  %v1547_v20 = vld [vmem:[%s4489_s3 + $0xa8] sm:$0xff]  ;;  %4521 = vst [vmem:[#allocation30_spill] sm:$0xff] %v4064_v30 }
 0x185   :  { %1695 = vmatpush.msra.mxu1 %v1549_v36  ;;  %4520 = vst [vmem:[#allocation29_spill] sm:$0xff] %v4046_v22  ;;  %1724 = vmatpush.msra.mxu2 %v1565_v35  ;;  %v1563_v36 = vld [vmem:[%s4489_s3 + $0x128] sm:$0xff]  ;;  %v613_v35 = vadd.f32 %v2895_v17, %v584_v12  ;;  %v729_v22 = vadd.f32 %v3155_v40, %v700_v48  ;;  %v1562_v17 = vld [vmem:[%s4489_s3 + $0x120] sm:$0xff] }
 0x186   :  { %1753 = vmatpush.msra.mxu3 %v1581_v59  ;;  %1667 = vmatpush.msra.mxu0 %v1532_v15  ;;  %v1530_v59 = vld [vmem:[%s4489_s3 + $0x20] sm:$0xff]  ;;  %v4084_v30 = vpop.f32.mrf.mxu1  ;;  %v587_v48 = vadd.f32 %v2947_v34, %v4001_v52  ;;  %v1577_v34 = vld [vmem:[%s4489_s3 + $0x198] sm:$0xff] }
 0x187   :  { %1696 = vmatpush.msra.mxu1 %v1548_v16  ;;  %1725 = vmatpush.msra.mxu2 %v1564_v14  ;;  %v1546_v15 = vld [vmem:[%s4489_s3 + $0xa0] sm:$0xff]  ;;  %v4073_v16 = vpop.f32.mrf.mxu0  ;;  %v845_v14 = vadd.f32 %v3455_v55, %v816_v53  ;;  %v642_v40 = vadd.f32 %v2925_v27, %v613_v35  ;;  %v1545_v55 = vld [vmem:[%s4489_s3 + $0x98] sm:$0xff] }
 0x188   :  { %1754 = vmatpush.msra.mxu3 %v1580_v21  ;;  %1668 = vmatpush.msra.mxu0 %v1531_v44  ;;  %v1578_v12 = vld [vmem:[%s4489_s3 + $0x1a0] sm:$0xff]  ;;  %v961_v21 = vadd.f32 %v3695_v38, %v932_v39  ;;  %v1529_v44 = vld [vmem:[%s4489_s3 + $0x18] sm:$0xff]  ;;  %v758_v38 = vadd.f32 %v3205_v4, %v729_v22  ;;  %v703_v39 = vadd.f32 %v3227_v0, %v4004_v11  ;;  %v1528_v0 = vld [vmem:[%s4489_s3 + $0x10] sm:$0xff] }
 0x189   :  { %1697 = vmatpush.msra.mxu1 %v1547_v20  ;;  %1726 = vmatpush.msra.mxu2 %v1563_v36  ;;  %v1561_v27 = vld [vmem:[%s4489_s3 + $0x118] sm:$0xff]  ;;  %v874_v53 = vadd.f32 %v3485_v23, %v845_v14  ;;  %v819_v4 = vadd.f32 %v3507_v60, %v4009_v18  ;;  %v1560_v23 = vld [vmem:[%s4489_s3 + $0x110] sm:$0xff]  ;;  %v671_v60 = vadd.f32 %v2939_v31, %v642_v40  ;;  %v1543_v20 = vld [vmem:[%s4489_s3 + $0x88] sm:$0xff] }
 0x18a   :  { %1755 = vmatpush.msra.mxu3 %v1579_v45  ;;  %1669 = vmatpush.msra.mxu0 %v1530_v59  ;;  %v990_v22 = vadd.f32 %v3725_v13, %v961_v21  ;;  %v616_v13 = vadd.f32 %v2955_v37, %v587_v48  ;;  %v787_v36 = vadd.f32 %v3219_v62, %v758_v38  ;;  %v1559_v31 = vld [vmem:[%s4489_s3 + $0x108] sm:$0xff] }
 0x18b   :  { %1698 = vmatpush.msra.mxu1 %v1546_v15  ;;  %1727 = vmatpush.msra.mxu2 %v1562_v17  ;;  %v732_v45 = vadd.f32 %v3235_v9, %v703_v39  ;;  %v1575_v37 = vld [vmem:[%s4489_s3 + $0x188] sm:$0xff]  ;;  %v4144_v35 = vpop.f32.mrf.mxu3  ;;  %v903_v59 = vadd.f32 %v3499_v50, %v874_v53  ;;  %v848_v15 = vadd.f32 %v3515_v3, %v819_v4  ;;  %v1526_v9 = vld [vmem:[%s4489_s3] sm:$0xff]  ;;  %v1620_v53 = vld [vmem:[%s4489_s3 + $0x2f0] sm:$0xff] }
 0x18c   :  { %1756 = vmatpush.msra.mxu3 %v1578_v12  ;;  %1403 = vmatmul.f32.gmra.mxu0 %v3326_v5  ;;  %v1544_v5 = vld [vmem:[%s4489_s3 + $0x90] sm:$0xff]  ;;  %v1019_v62 = vadd.f32 %v3739_v58, %v990_v22  ;;  %v1542_v17 = vld [vmem:[%s4489_s3 + $0x80] sm:$0xff]  ;;  %v1494_v58 = vmax.f32 %v671_v60, 0.0  ;;  %v645_v21 = vadd.f32 %v2985_v47, %v616_v13  ;;  %v590_v40 = vadd.f32 %v3007_v54, %v4001_v52  ;;  %v1605_v54 = vld [vmem:[%s4489_s3 + $0x278] sm:$0xff] }
 0x18d   :  { %1432 = vmatmul.f32.gmra.mxu1 %v3332_v6  ;;  %1461 = vmatmul.f32.gmra.mxu2 %v3344_v63  ;;  %v935_v6 = vadd.f32 %v3747_v42, %v4012_v43  ;;  %v1576_v63 = vld [vmem:[%s4489_s3 + $0x190] sm:$0xff]  ;;  %v1527_v42 = vld [vmem:[%s4489_s3 + $0x8] sm:$0xff]  ;;  %v1558_v50 = vld [vmem:[%s4489_s3 + $0x100] sm:$0xff]  ;;  %v1495_v48 = vmax.f32 %v787_v36, 0.0  ;;  %v1496_v38 = vmax.f32 %v903_v59, 0.0  ;;  %v877_v39 = vadd.f32 %v3545_v61, %v848_v15 }
 0x18e   :  { %1490 = vmatmul.f32.gmra.mxu3 %v3350_v8  ;;  %1670 = vmatpush.msra.mxu0 %v1529_v44  ;;  %v4126_v8 = vpop.f32.mrf.mxu2  ;;  %v1574_v3 = vld [vmem:[%s4489_s3 + $0x180] sm:$0xff]  ;;  %v706_v44 = vadd.f32 %v3307_v49, %v4004_v11  ;;  %v822_v47 = vadd.f32 %v3567_v41, %v4009_v18  ;;  %v674_v61 = vadd.f32 %v2999_v51, %v645_v21  ;;  %v1604_v41 = vld [vmem:[%s4489_s3 + $0x270] sm:$0xff]  ;;  %v1601_v21 = vld [vmem:[%s4489_s3 + $0x258] sm:$0xff] }
 0x18f   :  { %1699 = vmatpush.msra.mxu1 %v1545_v55  ;;  %1728 = vmatpush.msra.mxu2 %v1561_v27  ;;  %v4155_v12 = vpop.f32.mrf.mxu0  ;;  %v964_v14 = vadd.f32 %v3755_v25, %v935_v6  ;;  %v761_v25 = vadd.f32 %v3285_v33, %v732_v45  ;;  %v4170_v55 = vpop.f32.mrf.mxu1  ;;  %v1497_v27 = vmax.f32 %v1019_v62, 0.0  ;;  %v1621_v33 = vld [vmem:[%s4489_s3 + $0x2f8] sm:$0xff]  ;;  %v619_v4 = vadd.f32 %v3015_v57, %v590_v40  ;;  %v1603_v6 = vld [vmem:[%s4489_s3 + $0x268] sm:$0xff]  ;;  %v4527_v59 = vld [vmem:[#allocation10_spill] sm:$0xff] }
 0x190   :  { %1757 = vmatpush.msra.mxu3 %v1577_v34  ;;  %1671 = vmatpush.msra.mxu0 %v1528_v0  ;;  %v938_v34 = vadd.f32 %v3807_v32, %v4012_v43  ;;  %v735_v32 = vadd.f32 %v3315_v56, %v706_v44  ;;  %v906_v51 = vadd.f32 %v3559_v28, %v877_v39  ;;  %v4522_v0 = vld [vmem:[#allocation14_spill] sm:$0xff]  ;;  %v1619_v57 = vld [vmem:[%s4489_s3 + $0x2e8] sm:$0xff]  ;;  %v1502_v13 = vmax.f32 %v674_v61, 0.0  ;;  %v4528_v62 = vld [vmem:[#allocation4_spill] sm:$0xff] }
 0x191   :  { %1700 = vmatpush.msra.mxu1 %v1544_v5  ;;  %1729 = vmatpush.msra.mxu2 %v1560_v23  ;;  %v993_v49 = vadd.f32 %v3785_v10, %v964_v14  ;;  %v790_v10 = vadd.f32 %v3299_v46, %v761_v25  ;;  %v851_v5 = vadd.f32 %v4522_v0, %v822_v47  ;;  %v4523_v23 = vld [vmem:[#allocation21_spill] sm:$0xff]  ;;  %v1602_v28 = vld [vmem:[%s4489_s3 + $0x260] sm:$0xff]  ;;  %v4529_v14 = vld [vmem:[#allocation15_spill] sm:$0xff] }
 0x192   :  { %1758 = vmatpush.msra.mxu3 %v1576_v63  ;;  %1672 = vmatpush.msra.mxu0 %v1527_v42  ;;  %v4524_v63 = vld [vmem:[#allocation22_spill] sm:$0xff]  ;;  %v709_v15 = vadd.f32 %v4527_v59, %v4004_v11  ;;  %v941_v11 = vadd.f32 %v3867_v29, %v4012_v43  ;;  %v4532_v39 = vld [vmem:[#allocation3_spill] sm:$0xff]  ;;  %v4533_v43 = vld [vmem:[#allocation9_spill] sm:$0xff] }
 0x193   :  { %1701 = vmatpush.msra.mxu1 %v1543_v20  ;;  %1730 = vmatpush.msra.mxu2 %v1559_v31  ;;  %v1022_v46 = vadd.f32 %v4523_v23, %v993_v49  ;;  %v967_v56 = vadd.f32 %v4524_v63, %v938_v34  ;;  %v4206_v60 = vpop.f32.mrf.mxu3  ;;  %v4525_v20 = vld [vmem:[#allocation2_spill] sm:$0xff]  ;;  %v1503_v45 = vmax.f32 %v790_v10, 0.0  ;;  %v4526_v31 = vld [vmem:[#allocation8_spill] sm:$0xff]  ;;  %v4535_v34 = vld [vmem:[#allocation5_spill] sm:$0xff] }
 0x194   :  { %1759 = vmatpush.msra.mxu3 %v1575_v37  ;;  %1673 = vmatpush.msra.mxu0 %v1526_v9  ;;  %v648_v36 = vadd.f32 %v4525_v20, %v619_v4  ;;  %v764_v37 = vadd.f32 %v4526_v31, %v735_v32  ;;  %v593_v9 = vadd.f32 %v4528_v62, %v4001_v52  ;;  %v1618_v52 = vld [vmem:[%s4489_s3 + $0x2e0] sm:$0xff]  ;;  %v1636_v49 = vld [vmem:[%s4489_s3 + $0x370] sm:$0xff]  ;;  %v4252_v32 = vperm.slane %v3976_v19, 4  ;;  %v1635_v23 = vld [vmem:[%s4489_s3 + $0x368] sm:$0xff] }
 0x195   :  { %1702 = vmatpush.msra.mxu1 %v1542_v17  ;;  %1731 = vmatpush.msra.mxu2 %v1558_v50  ;;  %v1504_v17 = vmax.f32 %v906_v51, 0.0  ;;  %v880_v50 = vadd.f32 %v4529_v14, %v851_v5  ;;  %v1505_v40 = vmax.f32 %v1022_v46, 0.0  ;;  %v4537_v4 = vld [vmem:[#allocation18_spill] sm:$0xff]  ;;  %v1599_v51 = vld [vmem:[%s4489_s3 + $0x248] sm:$0xff]  ;;  %v970_v5 = vadd.f32 %v3875_v1, %v941_v11  ;;  %v4538_v1 = vld [vmem:[#allocation12_spill] sm:$0xff] }
 0x196   :  { %1760 = vmatpush.msra.mxu3 %v1574_v3  ;;  %1674 = vmatmul.f32.vlgmr.msra.gmra.mxu0 %v1494_v58  ;;  %v4194_v22 = vpop.f32.mrf.mxu2  ;;  %v4530_v3 = vld [vmem:[#allocation17_spill] sm:$0xff]  ;;  %v677_v29 = vadd.f32 %v4532_v39, %v648_v36  ;;  %v793_v47 = vadd.f32 %v4533_v43, %v764_v37  ;;  %v622_v61 = vadd.f32 %v4535_v34, %v593_v9  ;;  %v1598_v46 = vld [vmem:[%s4489_s3 + $0x240] sm:$0xff]  ;;  %v4287_v14 = vperm.slane %v3976_v19, 5  ;;  %v4543_v11 = vld [vmem:[#allocation20_spill] sm:$0xff] }
 0x197   :  { %1703 = vmatmul.f32.vlgmr.msra.gmra.mxu1 %v1495_v48  ;;  %1732 = vmatmul.f32.vlgmr.msra.gmra.mxu2 %v1496_v38  ;;  %v4211_v42 = vpop.f32.mrf.mxu0  ;;  %v825_v58 = vadd.f32 %v4530_v3, %v4009_v18  ;;  %v4531_v48 = vld [vmem:[#allocation23_spill] sm:$0xff]  ;;  %v4231_v44 = vpop.f32.mrf.mxu1  ;;  %v1600_v18 = vld [vmem:[%s4489_s3 + $0x250] sm:$0xff]  ;;  %v1637_v38 = vld [vmem:[%s4489_s3 + $0x378] sm:$0xff]  ;;  %v1048_v37 = vadd.f32 %v3927_v2, %v4252_v32  ;;  %v999_v9 = vadd.f32 %v3905_v7, %v970_v5 }
 0x198   :  { %1761 = vmatmul.f32.vlgmr.msra.gmra.mxu3 %v1497_v27  ;;  %1774 = vmatpush.msrb.mxu0 %v1605_v54  ;;  %v996_v25 = vadd.f32 %v4531_v48, %v967_v56  ;;  %v4534_v27 = vld [vmem:[#allocation11_spill] sm:$0xff]  ;;  %v1511_v63 = vmax.f32 %v793_v47, 0.0  ;;  %v1597_v59 = vld [vmem:[%s4489_s3 + $0x238] sm:$0xff]  ;;  %v1596_v2 = vld [vmem:[%s4489_s3 + $0x230] sm:$0xff]  ;;  %v1164_v47 = vadd.f32 %v4211_v42, %v4287_v14 }
 0x199   :  { %1803 = vmatpush.msrb.mxu1 %v1621_v33  ;;  %v738_v54 = vadd.f32 %v4534_v27, %v709_v15  ;;  %v1617_v33 = vld [vmem:[%s4489_s3 + $0x2d8] sm:$0xff]  ;;  %v854_v10 = vadd.f32 %v4537_v4, %v825_v58  ;;  %1832 = vmatpush.msrb.mxu2 %v1637_v38  ;;  %v1614_v58 = vld [vmem:[%s4489_s3 + $0x2c0] sm:$0xff]  ;;  %v4542_v48 = vld [vmem:[#allocation7_spill] sm:$0xff] }
 0x19a   :  { %1775 = vmatpush.msrb.mxu0 %v1604_v41  ;;  %v4536_v41 = vld [vmem:[#allocation16_spill] sm:$0xff]  ;;  %v1025_v0 = vadd.f32 %v3859_v24, %v996_v25  ;;  %v1510_v24 = vmax.f32 %v677_v29, 0.0  ;;  %v4541_v7 = vld [vmem:[#allocation13_spill] sm:$0xff]  ;;  %v1595_v38 = vld [vmem:[%s4489_s3 + $0x228] sm:$0xff] }
 0x19b   :  { %1804 = vmatpush.msrb.mxu1 %v1620_v53  ;;  %v909_v53 = vadd.f32 %v4536_v41, %v880_v50  ;;  %1833 = vmatpush.msrb.mxu2 %v1636_v49  ;;  %v767_v56 = vadd.f32 %v4538_v1, %v738_v54  ;;  %v1634_v50 = vld [vmem:[%s4489_s3 + $0x360] sm:$0xff]  ;;  %v4544_v39 = vld [vmem:[#allocation24_spill] sm:$0xff]  ;;  %v1613_v43 = vld [vmem:[%s4489_s3 + $0x2b8] sm:$0xff] }
 0x19c   :  { %1776 = vmatpush.msrb.mxu0 %v1603_v6  ;;  %v1616_v6 = vld [vmem:[%s4489_s3 + $0x2d0] sm:$0xff]  ;;  %v1513_v62 = vmax.f32 %v1025_v0, 0.0  ;;  %v1028_v29 = vadd.f32 %v4544_v39, %v999_v9  ;;  %v1594_v27 = vld [vmem:[%s4489_s3 + $0x220] sm:$0xff]  ;;  %v4546_v42 = vld [vmem:[#allocation27_spill] sm:$0xff] }
 0x19d   :  { %1805 = vmatpush.msrb.mxu1 %v1619_v57  ;;  %v1512_v36 = vmax.f32 %v909_v53, 0.0  ;;  %1834 = vmatpush.msrb.mxu2 %v1635_v23  ;;  %v796_v3 = vadd.f32 %v4541_v7, %v767_v56  ;;  %v1051_v53 = vadd.f32 %v4546_v42, %v4252_v32  ;;  %v1593_v4 = vld [vmem:[%s4489_s3 + $0x218] sm:$0xff]  ;;  %v1612_v0 = vld [vmem:[%s4489_s3 + $0x2b0] sm:$0xff] }
 0x19e   :  { %1777 = vmatpush.msrb.mxu0 %v1602_v28  ;;  %v4262_v57 = vpop.f32.mrf.mxu2  ;;  %v4539_v28 = vld [vmem:[#allocation6_spill] sm:$0xff]  ;;  %v1592_v23 = vld [vmem:[%s4489_s3 + $0x210] sm:$0xff]  ;;  %v1609_v9 = vld [vmem:[%s4489_s3 + $0x298] sm:$0xff] }
 0x19f   :  { %1706 = vmatmul.f32.gmra.mxu1 %v1503_v45  ;;  %1677 = vmatmul.f32.gmra.mxu0 %v1502_v13  ;;  %v4271_v13 = vpop.f32.mrf.mxu3  ;;  %v651_v20 = vadd.f32 %v4539_v28, %v622_v61  ;;  %v4540_v45 = vld [vmem:[#allocation19_spill] sm:$0xff]  ;;  %v4280_v15 = vpop.f32.mrf.mxu0  ;;  %v1519_v54 = vmax.f32 %v796_v3, 0.0  ;;  %v4545_v61 = vld [vmem:[#allocation25_spill] sm:$0xff]  ;;  %v4548_v56 = vld [vmem:[#allocation28_spill] sm:$0xff] }
 0x1a0   :  { %1735 = vmatmul.f32.gmra.mxu2 %v1504_v17  ;;  %1764 = vmatmul.f32.gmra.mxu3 %v1505_v40  ;;  %v883_v31 = vadd.f32 %v4540_v45, %v854_v10  ;;  %v1615_v17 = vld [vmem:[%s4489_s3 + $0x2c8] sm:$0xff]  ;;  %v1633_v40 = vld [vmem:[%s4489_s3 + $0x358] sm:$0xff]  ;;  %v1521_v10 = vmax.f32 %v1028_v29, 0.0  ;;  %v1080_v28 = vadd.f32 %v4548_v56, %v1051_v53  ;;  %v1652_v39 = vld [vmem:[%s4489_s3 + $0x3f0] sm:$0xff] }
 0x1a1   :  { %1778 = vmatpush.msrb.mxu0 %v1601_v21  ;;  %1806 = vmatpush.msrb.mxu1 %v1618_v52  ;;  %v4299_v21 = vpop.f32.mrf.mxu1  ;;  %v680_v25 = vadd.f32 %v4542_v48, %v651_v20  ;;  %v1591_v20 = vld [vmem:[%s4489_s3 + $0x208] sm:$0xff]  ;;  %v1653_v48 = vld [vmem:[%s4489_s3 + $0x3f8] sm:$0xff] }
 0x1a2   :  { %v912_v52 = vadd.f32 %v4543_v11, %v883_v31  ;;  %1835 = vmatpush.msrb.mxu2 %v1634_v50  ;;  %v1167_v31 = vadd.f32 %v4280_v15, %v4287_v14  ;;  %v1054_v15 = vadd.f32 %v4073_v16, %v4252_v32  ;;  %v1628_v50 = vld [vmem:[%s4489_s3 + $0x330] sm:$0xff]  ;;  %v1627_v16 = vld [vmem:[%s4489_s3 + $0x328] sm:$0xff]  ;;  %1861 = vmatpush.msrb.mxu3 %v1653_v48  ;;  %v1641_v48 = vld [vmem:[%s4489_s3 + $0x398] sm:$0xff] }
 0x1a3   :  { %1779 = vmatpush.msrb.mxu0 %v1600_v18  ;;  %1807 = vmatpush.msrb.mxu1 %v1617_v33  ;;  %v1077_v18 = vadd.f32 %v3935_v26, %v1048_v37  ;;  %v1632_v26 = vld [vmem:[%s4489_s3 + $0x350] sm:$0xff]  ;;  %v1518_v49 = vmax.f32 %v680_v25, 0.0  ;;  %v4550_v25 = vld [vmem:[#allocation30_spill] sm:$0xff] }
 0x1a4   :  { %1836 = vmatpush.msrb.mxu2 %v1633_v40  ;;  %v1520_v34 = vmax.f32 %v912_v52, 0.0  ;;  %v1196_v3 = vadd.f32 %v4299_v21, %v1167_v31  ;;  %v1083_v52 = vadd.f32 %v4084_v30, %v1054_v15  ;;  %1862 = vmatpush.msrb.mxu3 %v1652_v39  ;;  %v1651_v30 = vld [vmem:[%s4489_s3 + $0x3e8] sm:$0xff]  ;;  %v1644_v15 = vld [vmem:[%s4489_s3 + $0x3b0] sm:$0xff] }
 0x1a5   :  { %1780 = vmatpush.msrb.mxu0 %v1599_v51  ;;  %1808 = vmatpush.msrb.mxu1 %v1616_v6  ;;  %v1106_v41 = vadd.f32 %v4545_v61, %v1077_v18  ;;  %v1193_v51 = vadd.f32 %v4231_v44, %v1164_v47  ;;  %v1631_v6 = vld [vmem:[%s4489_s3 + $0x348] sm:$0xff]  ;;  %v1057_v61 = vadd.f32 %v4155_v12, %v4252_v32  ;;  %v4424_v32 = vperm.slane %v3976_v19, 6 }
 0x1a6   :  { %v4322_v33 = vpop.f32.mrf.mxu2  ;;  %1837 = vmatpush.msrb.mxu2 %v1632_v26  ;;  %v1611_v44 = vld [vmem:[%s4489_s3 + $0x2a8] sm:$0xff]  ;;  %1863 = vmatpush.msrb.mxu3 %v1651_v30 }
 0x1a7   :  { %1781 = vmatpush.msrb.mxu0 %v1598_v46  ;;  %1709 = vmatmul.f32.gmra.mxu1 %v1511_v63  ;;  %v4334_v5 = vpop.f32.mrf.mxu3  ;;  %v1169_v46 = vpop.f32.mrf.mxu0  ;;  %v4547_v63 = vld [vmem:[#allocation26_spill] sm:$0xff]  ;;  %v1222_v45 = vadd.f32 %v4262_v57, %v1193_v51  ;;  %v1225_v47 = vadd.f32 %v4322_v33, %v1196_v3  ;;  %v1086_v51 = vadd.f32 %v4170_v55, %v1057_v61  ;;  %v1647_v55 = vld [vmem:[%s4489_s3 + $0x3c8] sm:$0xff] }
 0x1a8   :  { %1680 = vmatmul.f32.gmra.mxu0 %v1510_v24  ;;  %1738 = vmatmul.f32.gmra.mxu2 %v1512_v36  ;;  %v1630_v24 = vld [vmem:[%s4489_s3 + $0x340] sm:$0xff]  ;;  %v1135_v1 = vadd.f32 %v4547_v63, %v1106_v41  ;;  %v1170_v26 = vadd.f32 %v1169_v46, %v4287_v14  ;;  %v1624_v41 = vld [vmem:[%s4489_s3 + $0x310] sm:$0xff] }
 0x1a9   :  { %1767 = vmatmul.f32.gmra.mxu3 %v1513_v62  ;;  %1782 = vmatpush.msrb.mxu0 %v1597_v59  ;;  %v1610_v36 = vld [vmem:[%s4489_s3 + $0x2a0] sm:$0xff]  ;;  %v1198_v37 = vpop.f32.mrf.mxu1  ;;  %v1629_v59 = vld [vmem:[%s4489_s3 + $0x338] sm:$0xff]  ;;  %v1251_v7 = vadd.f32 %v4271_v13, %v1222_v45  ;;  %v1607_v13 = vld [vmem:[%s4489_s3 + $0x288] sm:$0xff]  ;;  %v1254_v42 = vadd.f32 %v4334_v5, %v1225_v47 }
 0x1aa   :  { %1809 = vmatpush.msrb.mxu1 %v1615_v17  ;;  %1838 = vmatpush.msrb.mxu2 %v1631_v6  ;;  %v1590_v62 = vld [vmem:[%s4489_s3 + $0x200] sm:$0xff]  ;;  %v1498_v57 = vmax.f32 %v1135_v1, 0.0  ;;  %v4549_v17 = vld [vmem:[#allocation29_spill] sm:$0xff]  ;;  %v1199_v53 = vadd.f32 %v1198_v37, %v1170_v26  ;;  %v1115_v1 = vadd.f32 %v4194_v22, %v1086_v51 }
 0x1ab   :  { %1783 = vmatpush.msrb.mxu0 %v1596_v2  ;;  %v1109_v2 = vadd.f32 %v4549_v17, %v1080_v28  ;;  %v1499_v29 = vmax.f32 %v1251_v7, 0.0  ;;  %v1650_v33 = vld [vmem:[%s4489_s3 + $0x3e0] sm:$0xff]  ;;  %v1507_v5 = vmax.f32 %v1254_v42, 0.0  ;;  %v1645_v45 = vld [vmem:[%s4489_s3 + $0x3b8] sm:$0xff] }
 0x1ac   :  { %1810 = vmatpush.msrb.mxu1 %v1614_v58  ;;  %1839 = vmatpush.msrb.mxu2 %v1630_v24  ;;  %v1608_v58 = vld [vmem:[%s4489_s3 + $0x290] sm:$0xff]  ;;  %v1144_v31 = vadd.f32 %v4206_v60, %v1115_v1  ;;  %v1643_v60 = vld [vmem:[%s4489_s3 + $0x3a8] sm:$0xff]  ;;  %v1638_v47 = vld [vmem:[%s4489_s3 + $0x380] sm:$0xff] }
 0x1ad   :  { %1784 = vmatpush.msrb.mxu0 %v1595_v38  ;;  %v1138_v11 = vadd.f32 %v4550_v25, %v1109_v2  ;;  %v1626_v38 = vld [vmem:[%s4489_s3 + $0x320] sm:$0xff]  ;;  %1864 = vmatpush.msrb.mxu3 %v1650_v33  ;;  %v1648_v24 = vld [vmem:[%s4489_s3 + $0x3d0] sm:$0xff] }
 0x1ae   :  { %1811 = vmatpush.msrb.mxu1 %v1613_v43  ;;  %1840 = vmatpush.msrb.mxu2 %v1629_v59  ;;  %v1227_v40 = vpop.f32.mrf.mxu2  ;;  %v1606_v43 = vld [vmem:[%s4489_s3 + $0x280] sm:$0xff] }
 0x1af   :  { %1785 = vmatpush.msrb.mxu0 %v1594_v27  ;;  %1712 = vmatmul.f32.gmra.mxu1 %v1519_v54  ;;  %v1256_v21 = vpop.f32.mrf.mxu3  ;;  %v1172_v18 = vpop.f32.mrf.mxu0  ;;  %v1625_v27 = vld [vmem:[%s4489_s3 + $0x318] sm:$0xff]  ;;  %v1228_v6 = vadd.f32 %v1227_v40, %v1199_v53 }
 0x1b0   :  { %1683 = vmatmul.f32.gmra.mxu0 %v1518_v49  ;;  %1741 = vmatmul.f32.gmra.mxu2 %v1520_v34  ;;  %v1506_v49 = vmax.f32 %v1138_v11, 0.0  ;;  %v1112_v34 = vadd.f32 %v4126_v8, %v1083_v52  ;;  %v1623_v8 = vld [vmem:[%s4489_s3 + $0x308] sm:$0xff] }
 0x1b1   :  { %1770 = vmatmul.f32.gmra.mxu3 %v1521_v10  ;;  %1786 = vmatpush.msrb.mxu0 %v1593_v4  ;;  %v1201_v54 = vpop.f32.mrf.mxu1  ;;  %v1649_v4 = vld [vmem:[%s4489_s3 + $0x3d8] sm:$0xff]  ;;  %v1257_v56 = vadd.f32 %v1256_v21, %v1228_v6 }
 0x1b2   :  { %1812 = vmatpush.msrb.mxu1 %v1612_v0  ;;  %1841 = vmatpush.msrb.mxu2 %v1628_v50  ;;  %v1141_v10 = vadd.f32 %v4144_v35, %v1112_v34  ;;  %v1622_v0 = vld [vmem:[%s4489_s3 + $0x300] sm:$0xff] }
 0x1b3   :  { %1787 = vmatpush.msrb.mxu0 %v1592_v23  ;;  %1865 = vmatpush.msrb.mxu3 %v1649_v4  ;;  %v1173_v23 = vadd.f32 %v1172_v18, %v4287_v14  ;;  %v1646_v14 = vld [vmem:[%s4489_s3 + $0x3c0] sm:$0xff]  ;;  %v1515_v37 = vmax.f32 %v1257_v56, 0.0 }
 0x1b4   :  { %1813 = vmatpush.msrb.mxu1 %v1611_v44  ;;  %1842 = vmatpush.msrb.mxu2 %v1627_v16  ;;  %v1514_v63 = vmax.f32 %v1141_v10, 0.0 }
 0x1b5   :  { %1788 = vmatpush.msrb.mxu0 %v1591_v20  ;;  %1866 = vmatpush.msrb.mxu3 %v1648_v24  ;;  %v1202_v28 = vadd.f32 %v1201_v54, %v1173_v23 }
 0x1b6   :  { %1814 = vmatpush.msrb.mxu1 %v1610_v36  ;;  %1843 = vmatpush.msrb.mxu2 %v1626_v38  ;;  %v1230_v12 = vpop.f32.mrf.mxu2  ;;  %v1640_v38 = vld [vmem:[%s4489_s3 + $0x390] sm:$0xff] }
 0x1b7   :  { %1789 = vmatpush.msrb.mxu0 %v1590_v62  ;;  %v1259_v46 = vpop.f32.mrf.mxu3  ;;  %1867 = vmatpush.msrb.mxu3 %v1647_v55  ;;  %v1231_v22 = vadd.f32 %v1230_v12, %v1202_v28 }
 0x1b8   :  { %1790 = vmatmul.f32.vlgmr.msrb.gmra.mxu0 %v1498_v57  ;;  %1815 = vmatpush.msrb.mxu1 %v1609_v9  ;;  %v1522_v57 = vmax.f32 %v1144_v31, 0.0 }
 0x1b9   :  { %1844 = vmatpush.msrb.mxu2 %v1625_v27  ;;  %v1279_v44 = vpop.f32.mrf.mxu0  ;;  %1868 = vmatpush.msrb.mxu3 %v1646_v14  ;;  %v1260_v50 = vadd.f32 %v1259_v46, %v1231_v22 }
 0x1ba   :  { %1816 = vmatpush.msrb.mxu1 %v1608_v58  ;;  %v1280_v35 = vadd.f32 %v1279_v44, %v4424_v32  ;;  %v1308_v20 = vpop.f32.mrf.mxu1  ;;  %v1642_v58 = vld [vmem:[%s4489_s3 + $0x3a0] sm:$0xff] }
 0x1bb   :  { %1845 = vmatpush.msrb.mxu2 %v1624_v41  ;;  %1869 = vmatpush.msrb.mxu3 %v1645_v45 }
 0x1bc   :  { %1817 = vmatpush.msrb.mxu1 %v1607_v13  ;;  %v1309_v36 = vadd.f32 %v1308_v20, %v1280_v35  ;;  %v1523_v13 = vmax.f32 %v1260_v50, 0.0 }
 0x1bd   :  { %1846 = vmatpush.msrb.mxu2 %v1623_v8  ;;  %1870 = vmatpush.msrb.mxu3 %v1644_v15  ;;  %v557_v8 = vperm.slane %v3976_v19, 7 }
 0x1be   :  { %1818 = vmatpush.msrb.mxu1 %v1606_v43  ;;  %v1337_v59 = vpop.f32.mrf.mxu2 }
 0x1bf   :  { %1819 = vmatmul.f32.vlgmr.msrb.gmra.mxu1 %v1499_v29  ;;  %1847 = vmatpush.msrb.mxu2 %v1622_v0  ;;  %v1338_v62 = vadd.f32 %v1337_v59, %v1309_v36  ;;  %v1639_v29 = vld [vmem:[%s4489_s3 + $0x388] sm:$0xff] }
 0x1c0   :  { %1793 = vmatmul.f32.gmra.mxu0 %v1506_v49  ;;  %1871 = vmatpush.msrb.mxu3 %v1643_v60 }
 0x1c1   :  { %v1366_v9 = vpop.f32.mrf.mxu3 }
 0x1c2   :  { %v1367_v17 = vadd.f32 %v1366_v9, %v1338_v62  ;;  %1872 = vmatpush.msrb.mxu3 %v1642_v58 }
 0x1c3   :  { %v1282_v2 = vpop.f32.mrf.mxu0 }
 0x1c4   :  { %v1283_v7 = vadd.f32 %v1282_v2, %v4424_v32  ;;  %v1500_v3 = vmax.f32 %v1367_v17, 0.0  ;;  %v1311_v40 = vpop.f32.mrf.mxu1  ;;  %1873 = vmatpush.msrb.mxu3 %v1641_v48 }
 0x1c6   :  { %v1312_v16 = vadd.f32 %v1311_v40, %v1283_v7  ;;  %1848 = vmatmul.f32.vlgmr.msrb.gmra.mxu2 %v1500_v3  ;;  %1874 = vmatpush.msrb.mxu3 %v1640_v38 }
 0x1c7   :  { %1822 = vmatmul.f32.gmra.mxu1 %v1507_v5 }
 0x1c8   :  { %1796 = vmatmul.f32.gmra.mxu0 %v1514_v63  ;;  %1875 = vmatpush.msrb.mxu3 %v1639_v29 }
 0x1ca   :  { %v1340_v21 = vpop.f32.mrf.mxu2  ;;  %1876 = vmatpush.msrb.mxu3 %v1638_v47 }
 0x1cb   :  { %v1341_v25 = vadd.f32 %v1340_v21, %v1312_v16  ;;  %v1369_v11 = vpop.f32.mrf.mxu3 }
 0x1cd   :  { %v1370_v52 = vadd.f32 %v1369_v11, %v1341_v25  ;;  %v1285_v18 = vpop.f32.mrf.mxu0 }
 0x1ce   :  { %v1286_v39 = vadd.f32 %v1285_v18, %v4424_v32 }
 0x1cf   :  { %1825 = vmatmul.f32.gmra.mxu1 %v1515_v37  ;;  %v1508_v43 = vmax.f32 %v1370_v52, 0.0  ;;  %v1314_v26 = vpop.f32.mrf.mxu1 }
 0x1d0   :  { %1799 = vmatmul.f32.gmra.mxu0 %v1522_v57  ;;  %v1315_v30 = vadd.f32 %v1314_v26, %v1286_v39  ;;  %v1898_v26 = vld [vmem:[%s4491_s4] ss:$0 sm:$0xff] }
 0x1d1   :  { %1851 = vmatmul.f32.gmra.mxu2 %v1508_v43 }
 0x1d6   :  { %v1343_v27 = vpop.f32.mrf.mxu2  ;;  %v1372_v33 = vpop.f32.mrf.mxu3 }
 0x1d7   :  { %1828 = vmatmul.f32.gmra.mxu1 %v1523_v13  ;;  %v1344_v54 = vadd.f32 %v1343_v27, %v1315_v30  ;;  %v1288_v34 = vpop.f32.mrf.mxu0 }
 0x1d8   :  { %v1289_v61 = vadd.f32 %v1288_v34, %v4424_v32  ;;  %v1317_v42 = vpop.f32.mrf.mxu1 }
 0x1d9   :  { %v1373_v49 = vadd.f32 %v1372_v33, %v1344_v54 }
 0x1da   :  { %v1318_v53 = vadd.f32 %v1317_v42, %v1289_v61 }
 0x1db   :  { %v1516_v41 = vmax.f32 %v1373_v49, 0.0 }
 0x1dd   :  { %1854 = vmatmul.f32.gmra.mxu2 %v1516_v41 }
 0x1e0   :  { %v1375_v10 = vpop.f32.mrf.mxu3 }
 0x1e2   :  { %v1346_v4 = vpop.f32.mrf.mxu2 }
 0x1e3   :  { %v1347_v12 = vadd.f32 %v1346_v4, %v1318_v53 }
 0x1e5   :  { %v1376_v51 = vadd.f32 %v1375_v10, %v1347_v12 }
 0x1e7   :  { %v1524_v6 = vmax.f32 %v1376_v51, 0.0 }
 0x1e9   :  { %1857 = vmatmul.f32.gmra.mxu2 %v1524_v6 }
 0x1ea   :  { %v1424_v23 = vpop.f32.mrf.mxu1 }
 0x1eb   :  { %v1395_v0 = vpop.f32.mrf.mxu0 }
 0x1ec   :  { %v1396_v5 = vadd.f32 %v1395_v0, %v557_v8 }
 0x1ee   :  { %v1425_v46 = vadd.f32 %v1424_v23, %v1396_v5 }
 0x1f2   :  { %v1453_v44 = vpop.f32.mrf.mxu2  ;;  %v1482_v35 = vpop.f32.mrf.mxu3 }
 0x1f3   :  { %v1454_v24 = vadd.f32 %v1453_v44, %v1425_v46 }
 0x1f5   :  { %v1483_v32 = vadd.f32 %v1482_v35, %v1454_v24  ;;  %v1398_v55 = vpop.f32.mrf.mxu0 }
 0x1f6   :  { %v1399_v63 = vadd.f32 %v1398_v55, %v557_v8  ;;  %v1427_v14 = vpop.f32.mrf.mxu1 }
 0x1f7   :  { %v1501_v1 = vmax.f32 %v1483_v32, 0.0 }
 0x1f8   :  { %v1428_v56 = vadd.f32 %v1427_v14, %v1399_v63 }
 0x1f9   :  { %1877 = vmatmul.f32.vlgmr.msrb.gmra.mxu3 %v1501_v1 }
 0x1fc   :  { %v1456_v19 = vpop.f32.mrf.mxu2 }
 0x1fd   :  { %v1457_v28 = vadd.f32 %v1456_v19, %v1428_v56  ;;  %v1485_v20 = vpop.f32.mrf.mxu3 }
 0x1ff   :  { %v1486_v36 = vadd.f32 %v1485_v20, %v1457_v28  ;;  %v1401_v45 = vpop.f32.mrf.mxu0 }
 0x200   :  { %v1402_v31 = vadd.f32 %v1401_v45, %v557_v8  ;;  %v1430_v22 = vpop.f32.mrf.mxu1 }
 0x201   :  { %v1509_v37 = vmax.f32 %v1486_v36, 0.0 }
 0x202   :  { %v1431_v59 = vadd.f32 %v1430_v22, %v1402_v31 }
 0x203   :  { %1880 = vmatmul.f32.gmra.mxu3 %v1509_v37 }
 0x206   :  { %v1459_v62 = vpop.f32.mrf.mxu2 }
 0x207   :  { %v1460_v9 = vadd.f32 %v1459_v62, %v1431_v59  ;;  %v1488_v57 = vpop.f32.mrf.mxu3 }
 0x209   :  { %v1489_v17 = vadd.f32 %v1488_v57, %v1460_v9  ;;  %v1404_v2 = vpop.f32.mrf.mxu0 }
 0x20a   :  { %v1405_v15 = vadd.f32 %v1404_v2, %v557_v8  ;;  %v1433_v7 = vpop.f32.mrf.mxu1 }
 0x20b   :  { %v1517_v50 = vmax.f32 %v1489_v17, 0.0 }
 0x20c   :  { %v1434_v60 = vadd.f32 %v1433_v7, %v1405_v15 }
 0x20d   :  { %1883 = vmatmul.f32.gmra.mxu3 %v1517_v50 }
 0x210   :  { %v1462_v3 = vpop.f32.mrf.mxu2 }
 0x211   :  { %v1463_v58 = vadd.f32 %v1462_v3, %v1434_v60  ;;  %v1491_v40 = vpop.f32.mrf.mxu3 }
 0x213   :  { %v1492_v16 = vadd.f32 %v1491_v40, %v1463_v58  ;;  %v1675_v13 = vpop.f32.mrf.mxu0 }
 0x214   :  { %v1704_v21 = vpop.f32.mrf.mxu1  ;;  %v1676_v54 = vadd.f32 %v1898_v26, %v1675_v13 }
 0x215   :  { %v1525_v48 = vmax.f32 %v1492_v16, 0.0 }
 0x216   :  { %v1705_v49 = vadd.f32 %v1704_v21, %v1676_v54 }
 0x217   :  { %1886 = vmatmul.f32.gmra.mxu3 %v1525_v48 }
 0x21a   :  { %v1733_v25 = vpop.f32.mrf.mxu2 }
 0x21b   :  { %v1762_v11 = vpop.f32.mrf.mxu3  ;;  %v1734_v61 = vadd.f32 %v1733_v25, %v1705_v49 }
 0x21c   :  { %v1678_v52 = vpop.f32.mrf.mxu0  ;;  %v1707_v18 = vpop.f32.mrf.mxu1 }
 0x21d   :  { %v1763_v53 = vadd.f32 %v1762_v11, %v1734_v61  ;;  %v1679_v4 = vadd.f32 %v1898_v26, %v1678_v52 }
 0x21f   :  { %v1708_v51 = vadd.f32 %v1707_v18, %v1679_v4 }
 0x223   :  { %v1736_v38 = vpop.f32.mrf.mxu2  ;;  %v1765_v39 = vpop.f32.mrf.mxu3 }
 0x224   :  { %v1710_v43 = vpop.f32.mrf.mxu1  ;;  %v1737_v5 = vadd.f32 %v1736_v38, %v1708_v51 }
 0x225   :  { %v1681_v29 = vpop.f32.mrf.mxu0 }
 0x226   :  { %v1766_v24 = vadd.f32 %v1765_v39, %v1737_v5  ;;  %v1682_v35 = vadd.f32 %v1898_v26, %v1681_v29 }
 0x228   :  { %v1711_v1 = vadd.f32 %v1710_v43, %v1682_v35 }
 0x22b   :  { %v1739_v47 = vpop.f32.mrf.mxu2 }
 0x22c   :  { %v1768_v30 = vpop.f32.mrf.mxu3  ;;  %v1713_v33 = vpop.f32.mrf.mxu1  ;;  %v1740_v56 = vadd.f32 %v1739_v47, %v1711_v1 }
 0x22d   :  { %v1684_v27 = vpop.f32.mrf.mxu0 }
 0x22e   :  { %v1769_v45 = vadd.f32 %v1768_v30, %v1740_v56  ;;  %v1685_v31 = vadd.f32 %v1898_v26, %v1684_v27 }
 0x230   :  { %v1714_v62 = vadd.f32 %v1713_v33, %v1685_v31 }
 0x233   :  { %v1742_v34 = vpop.f32.mrf.mxu2 }
 0x234   :  { %v1771_v41 = vpop.f32.mrf.mxu3  ;;  %v1743_v57 = vadd.f32 %v1742_v34, %v1714_v62 }
 0x235   :  { %v1791_v42 = vpop.f32.mrf.mxu0 }
 0x236   :  { %v1792_v12 = vadd.f32 %v1791_v42, %v1763_v53  ;;  %v1772_v7 = vadd.f32 %v1771_v41, %v1743_v57 }
 0x23c   :  { %v1820_v8 = vpop.f32.mrf.mxu1 }
 0x23d   :  { %v1821_v0 = vadd.f32 %v1820_v8, %v1792_v12  ;;  %v1794_v44 = vpop.f32.mrf.mxu0 }
 0x23e   :  { %v1795_v55 = vadd.f32 %v1794_v44, %v1766_v24 }
 0x244   :  { %v1823_v32 = vpop.f32.mrf.mxu1 }
 0x245   :  { %v1824_v14 = vadd.f32 %v1823_v32, %v1795_v55  ;;  %v1797_v36 = vpop.f32.mrf.mxu0 }
 0x246   :  { %v1798_v22 = vadd.f32 %v1797_v36, %v1769_v45 }
 0x249   :  { %v1849_v10 = vpop.f32.mrf.mxu2 }
 0x24a   :  { %v1850_v6 = vadd.f32 %v1849_v10, %v1821_v0 }
 0x24c   :  { %v1826_v37 = vpop.f32.mrf.mxu1 }
 0x24d   :  { %v1827_v9 = vadd.f32 %v1826_v37, %v1798_v22  ;;  %v1800_v50 = vpop.f32.mrf.mxu0 }
 0x24e   :  { %v1801_v3 = vadd.f32 %v1800_v50, %v1772_v7 }
 0x254   :  { %v1852_v63 = vpop.f32.mrf.mxu2  ;;  %v1829_v60 = vpop.f32.mrf.mxu1 }
 0x255   :  { %v1853_v19 = vadd.f32 %v1852_v63, %v1824_v14  ;;  %v1830_v40 = vadd.f32 %v1829_v60, %v1801_v3 }
 0x260   :  { %v1855_v59 = vpop.f32.mrf.mxu2 }
 0x261   :  { %v1856_v17 = vadd.f32 %v1855_v59, %v1827_v9 }
 0x26c   :  { %v1858_v58 = vpop.f32.mrf.mxu2 }
 0x26d   :  { %v1859_v16 = vadd.f32 %v1858_v58, %v1830_v40 }
 0x27c   :  { %v1878_v23 = vpop.f32.mrf.mxu3 }
 0x27d   :  { %v1879_v46 = vadd.f32 %v1878_v23, %v1850_v6 }
 0x27f   :  { %1890 = vst [vmem:[%s4492_s5] sm:$0xff] %v1879_v46 }
 0x286   :  { %v1881_v28 = vpop.f32.mrf.mxu3 }
 0x287   :  { %v1882_v20 = vadd.f32 %v1881_v28, %v1853_v19 }
 0x289   :  { %1891 = vst [vmem:[%s4492_s5 + $0x8] sm:$0xff] %v1882_v20 }
 0x290   :  { %v1884_v2 = vpop.f32.mrf.mxu3 }
 0x291   :  { %v1885_v15 = vadd.f32 %v1884_v2, %v1856_v17 }
 0x293   :  { %1892 = vst [vmem:[%s4492_s5 + $0x10] sm:$0xff] %v1885_v15 }
 0x29a   :  { %v1887_v48 = vpop.f32.mrf.mxu3 }
 0x29b   :  { %v1888_v13 = vadd.f32 %v1887_v48, %v1859_v16 }
 0x29d   :  { %1893 = vst [vmem:[%s4492_s5 + $0x18] sm:$0xff] %v1888_v13 }

</bundles_post_ra>
